<compile_context>
chip_gen: v5e
topology: v5e:2x2
jax: 0.10.0
libtpu: 0.0.40
codegen_flags: <defaults>
</compile_context>

<pallas_src>
import functools

import jax
import jax.numpy as jnp
from jax.experimental import pallas as pl
from jax.experimental.pallas import tpu as pltpu


def _pick_tk(K, N, tile_bytes, itemsize=2):
    """Pick the reduction-tile size tk for a (K, N) weight streamed as (tk, N) tiles.

    tk divides K, is a multiple of 128 (unless K itself is not), and keeps a tile at
    roughly <= tile_bytes (never below 128 rows).
    """
    if K % 128 != 0:
        # TODO(synk): pad irregular K to a multiple of 128 instead of one big tile.
        return K
    cap = max(128, ((tile_bytes // (N * itemsize)) // 128) * 128)
    tk = 128
    t = 256
    lim = min(K, cap)
    while t <= lim:
        if K % t == 0:
            tk = t
        t += 128
    return tk


def _fused_mlp_kernel(
    x_ref, b1_ref, b2_ref, b3_ref,        # VMEM-resident inputs
    w1_hbm, w2_hbm, w3_hbm,               # HBM weight refs (manual DMA)
    out_ref,                              # VMEM output (M, C)
    acc_ref, act1_ref, act2_ref,          # VMEM scratch: f32 acc, bf16 activations
    wbuf1, wbuf2, wbuf3,                  # VMEM weight double-buffers (2, tk, N)
    sem1, sem2, sem3,                     # DMA semaphores, shape (2,)
    *, tk1, tk2, tk3,
):
    M = x_ref.shape[0]
    F = x_ref.shape[1]
    H1 = act1_ref.shape[1]
    H2 = act2_ref.shape[1]
    C = out_ref.shape[1]

    def wdma(w_hbm, wbuf, sem, tk, kk, slot):
        # (tk, N) weight tile: tk contiguous rows of W[K, N].
        return pltpu.make_async_copy(
            w_hbm.at[pl.ds(kk * tk, tk)], wbuf.at[slot], sem.at[slot])

    # Prefetch tile 0 of every layer's weights up front so the HBM weight stream
    # never stalls at a layer boundary.
    wdma(w1_hbm, wbuf1, sem1, tk1, 0, 0).start()
    wdma(w2_hbm, wbuf2, sem2, tk2, 0, 0).start()
    wdma(w3_hbm, wbuf3, sem3, tk3, 0, 0).start()

    def vmem_slice(ref, tk):
        def read(kk):
            start = kk * tk
            if tk % 128 == 0:
                start = pl.multiple_of(start, 128)
            return ref[:, pl.ds(start, tk)]
        return read

    def run_layer(read_x, K, N, tk, w_hbm, wbuf, sem, b_ref, write_out, relu):
        # Tile 0 of this layer was already issued at kernel start.
        nk = K // tk
        acc_ref[:, :N] = jnp.zeros((M, N), dtype=jnp.float32)

        def body(kk, carry):
            slot = kk % 2
            # Wait on the tile in flight for `slot` (shape + semaphore determine the wait).
            wdma(w_hbm, wbuf, sem, tk, 0, slot).wait()

            @pl.when(kk + 1 < nk)
            def _():
                wdma(w_hbm, wbuf, sem, tk, kk + 1, 1 - slot).start()

            acc_ref[:, :N] += jnp.dot(
                read_x(kk), wbuf[slot], preferred_element_type=jnp.float32)
            return carry

        jax.lax.fori_loop(0, nk, body, 0)

        y = acc_ref[:, :N] + b_ref[...]     # f32 bias, broadcast over rows
        if relu:
            y = jnp.maximum(y, 0.0)
        write_out(y)

    def write_act1(y):
        act1_ref[...] = y.astype(act1_ref.dtype)

    def write_act2(y):
        act2_ref[...] = y.astype(act2_ref.dtype)

    def write_logits(y):
        out_ref[...] = y.astype(out_ref.dtype)

    # fc1 + ReLU, fc2 + ReLU, fc_final — all with activations kept in VMEM.
    run_layer(vmem_slice(x_ref, tk1), F, H1, tk1, w1_hbm, wbuf1, sem1,
              b1_ref, write_act1, relu=True)
    run_layer(vmem_slice(act1_ref, tk2), H1, H2, tk2, w2_hbm, wbuf2, sem2,
              b2_ref, write_act2, relu=True)
    run_layer(vmem_slice(act2_ref, tk3), H2, C, tk3, w3_hbm, wbuf3, sem3,
              b3_ref, write_logits, relu=False)


def fused_parallel_mlp(x, w1, b1, w2, b2, w3, b3, *,
                       max_weight_tile_bytes=4 << 20,
                       out_dtype=jnp.float32,
                       act_dtype=jnp.bfloat16):
    """logits = fc3(relu(fc2(relu(fc1(x))))) as one fused Pallas kernel."""
    M, F = x.shape
    Fw, H1 = w1.shape
    H1w, H2 = w2.shape
    H2w, C = w3.shape
    assert F == Fw and H1 == H1w and H2 == H2w, (x.shape, w1.shape, w2.shape, w3.shape)
    assert b1.shape == (H1,) and b2.shape == (H2,) and b3.shape == (C,)

    wd = jnp.dtype(w1.dtype).itemsize
    ad = jnp.dtype(act_dtype).itemsize
    od = jnp.dtype(out_dtype).itemsize

    tk1 = _pick_tk(F, H1, max_weight_tile_bytes, wd)
    tk2 = _pick_tk(H1, H2, max_weight_tile_bytes, wd)
    tk3 = _pick_tk(H2, C, max_weight_tile_bytes, wd)
    # Explicit divisibility guards (review correctness concern).
    assert F % tk1 == 0 and H1 % tk2 == 0 and H2 % tk3 == 0, (tk1, tk2, tk3)

    Hmax = max(H1, H2, C)

    scratch_bytes = (
        M * Hmax * 4                                   # f32 accumulator
        + M * (H1 + H2) * ad                           # bf16 intermediate activations
        + 2 * (tk1 * H1 + tk2 * H2 + tk3 * C) * wd     # weight double buffers
    )
    io_bytes = 2 * (M * F * ad + (H1 + H2 + C) * 4 + M * C * od)
    vmem_limit = int(min(max(scratch_bytes + io_bytes + (4 << 20), 16 << 20), 56 << 20))
    assert scratch_bytes + io_bytes < vmem_limit, (
        "VMEM budget exceeded; lower max_weight_tile_bytes")

    flops = 2 * M * (F * H1 + H1 * H2 + H2 * C)
    bytes_accessed = ((F * H1 + H1 * H2 + H2 * C) * wd
                      + M * F * ad + (H1 + H2 + C) * 4 + M * C * od)

    kernel = functools.partial(_fused_mlp_kernel, tk1=tk1, tk2=tk2, tk3=tk3)

    b1_2d = b1.reshape(1, H1).astype(jnp.float32)
    b2_2d = b2.reshape(1, H2).astype(jnp.float32)
    b3_2d = b3.reshape(1, C).astype(jnp.float32)

    return pl.pallas_call(
        kernel,
        out_shape=jax.ShapeDtypeStruct((M, C), out_dtype),
        grid_spec=pltpu.PrefetchScalarGridSpec(
            num_scalar_prefetch=0,
            grid=(1,),
            in_specs=[
                pl.BlockSpec((M, F), lambda i: (0, 0)),    # X: VMEM resident
                pl.BlockSpec((1, H1), lambda i: (0, 0)),   # b1 (f32)
                pl.BlockSpec((1, H2), lambda i: (0, 0)),   # b2 (f32)
                pl.BlockSpec((1, C), lambda i: (0, 0)),    # b3 (f32)
                pl.BlockSpec(memory_space=pl.ANY),         # w1: HBM, manual DMA
                pl.BlockSpec(memory_space=pl.ANY),         # w2
                pl.BlockSpec(memory_space=pl.ANY),         # w3
            ],
            out_specs=pl.BlockSpec((M, C), lambda i: (0, 0)),
            scratch_shapes=[
                pltpu.VMEM((M, Hmax), jnp.float32),        # shared f32 accumulator
                pltpu.VMEM((M, H1), act_dtype),            # act1
                pltpu.VMEM((M, H2), act_dtype),            # act2
                pltpu.VMEM((2, tk1, H1), w1.dtype),        # w1 double buffer
                pltpu.VMEM((2, tk2, H2), w2.dtype),        # w2 double buffer
                pltpu.VMEM((2, tk3, C), w3.dtype),         # w3 double buffer
                pltpu.SemaphoreType.DMA((2,)),
                pltpu.SemaphoreType.DMA((2,)),
                pltpu.SemaphoreType.DMA((2,)),
            ],
        ),
        compiler_params=pltpu.CompilerParams(
            dimension_semantics=("arbitrary",),
            vmem_limit_bytes=vmem_limit,
        ),
        cost_estimate=pl.CostEstimate(
            flops=flops, transcendentals=0, bytes_accessed=bytes_accessed),
    )(x.astype(act_dtype), b1_2d, b2_2d, b3_2d, w1, w2, w3)


class ParallelMLPPallas:
    """Deterministically-initialized JAX/Pallas equivalent of ParallelMLP.

    Weights are bf16 [in, out]; biases f32 (added in f32 inside the kernel).
    Intermediate activations are bf16, final logits f32.
    """

    def __init__(self, num_features, num_classes, hidden_sizes=(1024, 1024, 1024),
                 key=jax.random.PRNGKey(0), param_dtype=jnp.bfloat16,
                 max_weight_tile_bytes=4 << 20):
        k = jax.random.split(key, 6)
        h0, h1, _ = hidden_sizes
        self.max_weight_tile_bytes = max_weight_tile_bytes

        def init_w(kk, fan_in, fan_out):
            bound = 1.0 / float(fan_in) ** 0.5
            w = jax.random.uniform(kk, (fan_in, fan_out), jnp.float32,
                                   minval=-bound, maxval=bound)
            return w.astype(param_dtype)

        def init_b(kk, fan_in, fan_out):
            bound = 1.0 / float(fan_in) ** 0.5
            return jax.random.uniform(kk, (fan_out,), jnp.float32,
                                      minval=-bound, maxval=bound)

        self.w1, self.b1 = init_w(k[0], num_features, h0), init_b(k[1], num_features, h0)
        self.w2, self.b2 = init_w(k[2], h0, h1), init_b(k[3], h0, h1)
        self.w3, self.b3 = init_w(k[4], h1, num_classes), init_b(k[5], h1, num_classes)

    def __call__(self, x):
        return fused_parallel_mlp(
            x, self.w1, self.b1, self.w2, self.b2, self.w3, self.b3,
            max_weight_tile_bytes=self.max_weight_tile_bytes)


if __name__ == "__main__":
    # Small shapes consistent with the module (hidden sizes scaled down from 20480).
    batch = 8
    num_features = 256
    num_classes = 128
    hidden_sizes = (1024, 1024, 1024)

    key = jax.random.PRNGKey(0)
    xkey, pkey = jax.random.split(key)
    x = jax.random.normal(xkey, (batch, num_features), jnp.float32)

    # Use small weight tiles at demo scale so the multi-tile, double-buffered DMA
    # streaming path is exercised (the default 4 MiB tiles would make every layer a
    # single tile at these sizes).
    model = ParallelMLPPallas(num_features, num_classes, hidden_sizes, key=pkey,
                              max_weight_tile_bytes=256 * 1024)

    logits = model(x)
    jax.block_until_ready(logits)

    # Reference in plain JAX with the same numerics (bf16 inputs/weights, f32
    # accumulate + bias, bf16 intermediates).  NOTE: this matches the kernel's
    # documented bf16 policy, not a pure-f32 PyTorch ParallelMLP.
    xb = x.astype(jnp.bfloat16)
    h = jnp.maximum(
        jnp.dot(xb, model.w1, preferred_element_type=jnp.float32) + model.b1, 0.0
    ).astype(jnp.bfloat16)
    h = jnp.maximum(
        jnp.dot(h, model.w2, preferred_element_type=jnp.float32) + model.b2, 0.0
    ).astype(jnp.bfloat16)
    ref = jnp.dot(h, model.w3, preferred_element_type=jnp.float32) + model.b3

    assert logits.shape == (batch, num_classes)
    assert logits.dtype == jnp.float32
    max_err = jnp.max(jnp.abs(logits - ref))
    assert jnp.allclose(logits, ref, atol=2e-2, rtol=2e-2), max_err

    print("KERNEL_OK")
</pallas_src>

<mosaic_0001>
module attributes {stable_mosaic.version = 11 : i64} {
  func.func @_fused_mlp_kernel(%arg0: i32, %arg1: memref<8x256xbf16, #tpu.memory_space<vmem>>, %arg2: memref<1x1024xf32, #tpu.memory_space<vmem>>, %arg3: memref<1x1024xf32, #tpu.memory_space<vmem>>, %arg4: memref<1x128xf32, #tpu.memory_space<vmem>>, %arg5: memref<256x1024xbf16, #tpu.memory_space<any>>, %arg6: memref<1024x1024xbf16, #tpu.memory_space<any>>, %arg7: memref<1024x128xbf16, #tpu.memory_space<any>>, %arg8: memref<8x128xf32, #tpu.memory_space<vmem>>, %arg9: memref<8x1024xf32, #tpu.memory_space<vmem>>, %arg10: memref<8x1024xbf16, #tpu.memory_space<vmem>>, %arg11: memref<8x1024xbf16, #tpu.memory_space<vmem>>, %arg12: memref<2x128x1024xbf16, #tpu.memory_space<vmem>>, %arg13: memref<2x128x1024xbf16, #tpu.memory_space<vmem>>, %arg14: memref<2x1024x128xbf16, #tpu.memory_space<vmem>>, %arg15: memref<2x!tpu.dma_semaphore, #tpu.memory_space<semaphore_mem>>, %arg16: memref<2x!tpu.dma_semaphore, #tpu.memory_space<semaphore_mem>>, %arg17: memref<2x!tpu.dma_semaphore, #tpu.memory_space<semaphore_mem>>) attributes {dimension_semantics = [#tpu.dimension_semantics<arbitrary>], iteration_bounds = array<i64: 1>, scalar_prefetch = 0 : i64, scratch_operands = 9 : i64, tpu.core_type = #tpu.core_type<tc>, window_params = [{pipeline_mode = #tpu.pipeline_mode<synchronous>, transform_indices = @transform_0, window_bounds = array<i64: 8, 256>}, {pipeline_mode = #tpu.pipeline_mode<synchronous>, transform_indices = @transform_1, window_bounds = array<i64: 1, 1024>}, {pipeline_mode = #tpu.pipeline_mode<synchronous>, transform_indices = @transform_2, window_bounds = array<i64: 1, 1024>}, {pipeline_mode = #tpu.pipeline_mode<synchronous>, transform_indices = @transform_3, window_bounds = array<i64: 1, 128>}, {}, {}, {}, {pipeline_mode = #tpu.pipeline_mode<synchronous>, transform_indices = @transform_7, window_bounds = array<i64: 8, 128>}]} {
    %c0_i32 = arith.constant 0 : i32
    %c0_i32_0 = arith.constant 0 : i32
    %c0_i32_1 = arith.constant 0 : i32
    %c0_i32_2 = arith.constant 0 : i32
    %0 = tpu.memref_slice %arg5[%c0_i32_1, %c0_i32_2] : memref<256x1024xbf16, #tpu.memory_space<any>> -> memref<128x1024xbf16, #tpu.memory_space<any>>
    %c0_i32_3 = arith.constant 0 : i32
    %c0_i32_4 = arith.constant 0 : i32
    %1 = tpu.memref_slice %arg12[%c0_i32, %c0_i32_3, %c0_i32_4] : memref<2x128x1024xbf16, #tpu.memory_space<vmem>> -> memref<1x128x1024xbf16, #tpu.memory_space<vmem>>
    %2 = tpu.memref_squeeze %1 : memref<1x128x1024xbf16, #tpu.memory_space<vmem>> -> memref<128x1024xbf16, #tpu.memory_space<vmem>>
    %3 = tpu.memref_slice %arg15[%c0_i32_0] : memref<2x!tpu.dma_semaphore, #tpu.memory_space<semaphore_mem>> -> memref<1x!tpu.dma_semaphore, #tpu.memory_space<semaphore_mem>>
    %4 = tpu.memref_squeeze %3 : memref<1x!tpu.dma_semaphore, #tpu.memory_space<semaphore_mem>> -> memref<!tpu.dma_semaphore, #tpu.memory_space<semaphore_mem>>
    tpu.enqueue_dma source(%0 : memref<128x1024xbf16, #tpu.memory_space<any>>) target(%2 : memref<128x1024xbf16, #tpu.memory_space<vmem>>) target_semaphore(%4 : memref<!tpu.dma_semaphore, #tpu.memory_space<semaphore_mem>>)
    %c0_i32_5 = arith.constant 0 : i32
    %c0_i32_6 = arith.constant 0 : i32
    %c0_i32_7 = arith.constant 0 : i32
    %c0_i32_8 = arith.constant 0 : i32
    %5 = tpu.memref_slice %arg6[%c0_i32_7, %c0_i32_8] : memref<1024x1024xbf16, #tpu.memory_space<any>> -> memref<128x1024xbf16, #tpu.memory_space<any>>
    %c0_i32_9 = arith.constant 0 : i32
    %c0_i32_10 = arith.constant 0 : i32
    %6 = tpu.memref_slice %arg13[%c0_i32_5, %c0_i32_9, %c0_i32_10] : memref<2x128x1024xbf16, #tpu.memory_space<vmem>> -> memref<1x128x1024xbf16, #tpu.memory_space<vmem>>
    %7 = tpu.memref_squeeze %6 : memref<1x128x1024xbf16, #tpu.memory_space<vmem>> -> memref<128x1024xbf16, #tpu.memory_space<vmem>>
    %8 = tpu.memref_slice %arg16[%c0_i32_6] : memref<2x!tpu.dma_semaphore, #tpu.memory_space<semaphore_mem>> -> memref<1x!tpu.dma_semaphore, #tpu.memory_space<semaphore_mem>>
    %9 = tpu.memref_squeeze %8 : memref<1x!tpu.dma_semaphore, #tpu.memory_space<semaphore_mem>> -> memref<!tpu.dma_semaphore, #tpu.memory_space<semaphore_mem>>
    tpu.enqueue_dma source(%5 : memref<128x1024xbf16, #tpu.memory_space<any>>) target(%7 : memref<128x1024xbf16, #tpu.memory_space<vmem>>) target_semaphore(%9 : memref<!tpu.dma_semaphore, #tpu.memory_space<semaphore_mem>>)
    %c0_i32_11 = arith.constant 0 : i32
    %c0_i32_12 = arith.constant 0 : i32
    %c0_i32_13 = arith.constant 0 : i32
    %c0_i32_14 = arith.constant 0 : i32
    %10 = tpu.memref_slice %arg7[%c0_i32_13, %c0_i32_14] : memref<1024x128xbf16, #tpu.memory_space<any>> -> memref<1024x128xbf16, #tpu.memory_space<any>>
    %c0_i32_15 = arith.constant 0 : i32
    %c0_i32_16 = arith.constant 0 : i32
    %11 = tpu.memref_slice %arg14[%c0_i32_11, %c0_i32_15, %c0_i32_16] : memref<2x1024x128xbf16, #tpu.memory_space<vmem>> -> memref<1x1024x128xbf16, #tpu.memory_space<vmem>>
    %12 = tpu.memref_squeeze %11 : memref<1x1024x128xbf16, #tpu.memory_space<vmem>> -> memref<1024x128xbf16, #tpu.memory_space<vmem>>
    %13 = tpu.memref_slice %arg17[%c0_i32_12] : memref<2x!tpu.dma_semaphore, #tpu.memory_space<semaphore_mem>> -> memref<1x!tpu.dma_semaphore, #tpu.memory_space<semaphore_mem>>
    %14 = tpu.memref_squeeze %13 : memref<1x!tpu.dma_semaphore, #tpu.memory_space<semaphore_mem>> -> memref<!tpu.dma_semaphore, #tpu.memory_space<semaphore_mem>>
    tpu.enqueue_dma source(%10 : memref<1024x128xbf16, #tpu.memory_space<any>>) target(%12 : memref<1024x128xbf16, #tpu.memory_space<vmem>>) target_semaphore(%14 : memref<!tpu.dma_semaphore, #tpu.memory_space<semaphore_mem>>)
    %cst = arith.constant 0.000000e+00 : f32
    %15 = vector.broadcast %cst : f32 to vector<8x1024xf32>
    %c0 = arith.constant 0 : index
    %c0_17 = arith.constant 0 : index
    %16 = vector.load %arg9[%c0, %c0_17] : memref<8x1024xf32, #tpu.memory_space<vmem>>, vector<8x1024xf32>
    tpu.vector_store %arg9[%c0, %c0_17], %15 {strides = array<i32>} : memref<8x1024xf32, #tpu.memory_space<vmem>>, vector<8x1024xf32>,
    %c0_i32_18 = arith.constant 0 : i32
    %c2_i32 = arith.constant 2 : i32
    %17 = arith.addi %c0_i32_18, %c2_i32 : i32
    %c1_i32 = arith.constant 1 : i32
    scf.for %arg18 = %c0_i32_18 to %17 step %c1_i32  : i32 {
      %c2_i32_72 = arith.constant 2 : i32
      %c0_i32_73 = arith.constant 0 : i32
      %74 = arith.cmpi eq, %c2_i32_72, %c0_i32_73 : i32
      %c1_i32_74 = arith.constant 1 : i32
      %75 = arith.select %74, %c1_i32_74, %c2_i32_72 : i32
      %76 = arith.remsi %arg18, %75 : i32
      %c0_i32_75 = arith.constant 0 : i32
      %77 = arith.cmpi ne, %76, %c0_i32_75 : i32
      %c0_i32_76 = arith.constant 0 : i32
      %78 = arith.cmpi slt, %76, %c0_i32_76 : i32
      %c0_i32_77 = arith.constant 0 : i32
      %79 = arith.cmpi slt, %75, %c0_i32_77 : i32
      %80 = arith.xori %78, %79 : i1
      %81 = arith.andi %80, %77 : i1
      %82 = arith.addi %76, %75 : i32
      %83 = arith.select %81, %82, %76 : i32
      %c0_i32_78 = arith.constant 0 : i32
      %c0_i32_79 = arith.constant 0 : i32
      %84 = tpu.memref_slice %arg5[%c0_i32_78, %c0_i32_79] : memref<256x1024xbf16, #tpu.memory_space<any>> -> memref<128x1024xbf16, #tpu.memory_space<any>>
      %c0_i32_80 = arith.constant 0 : i32
      %c0_i32_81 = arith.constant 0 : i32
      %85 = tpu.memref_slice %arg12[%83, %c0_i32_80, %c0_i32_81] : memref<2x128x1024xbf16, #tpu.memory_space<vmem>> -> memref<1x128x1024xbf16, #tpu.memory_space<vmem>>
      %86 = tpu.memref_squeeze %85 : memref<1x128x1024xbf16, #tpu.memory_space<vmem>> -> memref<128x1024xbf16, #tpu.memory_space<vmem>>
      %87 = tpu.memref_slice %arg15[%83] : memref<2x!tpu.dma_semaphore, #tpu.memory_space<semaphore_mem>> -> memref<1x!tpu.dma_semaphore, #tpu.memory_space<semaphore_mem>>
      %88 = tpu.memref_squeeze %87 : memref<1x!tpu.dma_semaphore, #tpu.memory_space<semaphore_mem>> -> memref<!tpu.dma_semaphore, #tpu.memory_space<semaphore_mem>>
      tpu.wait_dma2 semaphore(%88 : memref<!tpu.dma_semaphore, #tpu.memory_space<semaphore_mem>>) src(%84 : memref<128x1024xbf16, #tpu.memory_space<any>>) dst(%86 : memref<128x1024xbf16, #tpu.memory_space<vmem>>)
      %c1_i32_82 = arith.constant 1 : i32
      %89 = arith.addi %arg18, %c1_i32_82 : i32
      %c2_i32_83 = arith.constant 2 : i32
      %90 = arith.cmpi slt, %89, %c2_i32_83 : i32
      %91 = arith.extui %90 : i1 to i32
      %c0_i32_84 = arith.constant 0 : i32
      %92 = arith.cmpi ne, %91, %c0_i32_84 : i32
      scf.if %92 {
        %c1_i32_93 = arith.constant 1 : i32
        %104 = arith.addi %arg18, %c1_i32_93 : i32
        %c1_i32_94 = arith.constant 1 : i32
        %105 = arith.subi %c1_i32_94, %83 : i32
        %c128_i32_95 = arith.constant 128 : i32
        %106 = arith.muli %104, %c128_i32_95 : i32
        %c0_i32_96 = arith.constant 0 : i32
        %107 = tpu.memref_slice %arg5[%106, %c0_i32_96] : memref<256x1024xbf16, #tpu.memory_space<any>> -> memref<128x1024xbf16, #tpu.memory_space<any>>
        %c0_i32_97 = arith.constant 0 : i32
        %c0_i32_98 = arith.constant 0 : i32
        %108 = tpu.memref_slice %arg12[%105, %c0_i32_97, %c0_i32_98] : memref<2x128x1024xbf16, #tpu.memory_space<vmem>> -> memref<1x128x1024xbf16, #tpu.memory_space<vmem>>
        %109 = tpu.memref_squeeze %108 : memref<1x128x1024xbf16, #tpu.memory_space<vmem>> -> memref<128x1024xbf16, #tpu.memory_space<vmem>>
        %110 = tpu.memref_slice %arg15[%105] : memref<2x!tpu.dma_semaphore, #tpu.memory_space<semaphore_mem>> -> memref<1x!tpu.dma_semaphore, #tpu.memory_space<semaphore_mem>>
        %111 = tpu.memref_squeeze %110 : memref<1x!tpu.dma_semaphore, #tpu.memory_space<semaphore_mem>> -> memref<!tpu.dma_semaphore, #tpu.memory_space<semaphore_mem>>
        tpu.enqueue_dma source(%107 : memref<128x1024xbf16, #tpu.memory_space<any>>) target(%109 : memref<128x1024xbf16, #tpu.memory_space<vmem>>) target_semaphore(%111 : memref<!tpu.dma_semaphore, #tpu.memory_space<semaphore_mem>>)
      } else {
      }
      %c0_85 = arith.constant 0 : index
      %c0_86 = arith.constant 0 : index
      %93 = vector.load %arg9[%c0_85, %c0_86] : memref<8x1024xf32, #tpu.memory_space<vmem>>, vector<8x1024xf32>
      %c128_i32 = arith.constant 128 : i32
      %94 = arith.muli %arg18, %c128_i32 : i32
      %95 = tpu.assume_multiple %94, 128 : i32
      %c0_87 = arith.constant 0 : index
      %96 = arith.index_cast %95 : i32 to index
      %97 = vector.load %arg1[%c0_87, %96] : memref<8x256xbf16, #tpu.memory_space<vmem>>, vector<8x128xbf16>
      %98 = arith.index_cast %83 : i32 to index
      %c0_88 = arith.constant 0 : index
      %c0_89 = arith.constant 0 : index
      %99 = vector.load %arg12[%98, %c0_88, %c0_89] : memref<2x128x1024xbf16, #tpu.memory_space<vmem>>, vector<1x128x1024xbf16>
      %100 = vector.shape_cast %99 : vector<1x128x1024xbf16> to vector<128x1024xbf16>
      %cst_90 = arith.constant dense<0.000000e+00> : vector<8x1024xf32>
      %101 = tpu.matmul %97, %100, %cst_90 {dimension_numbers = #tpu.dot_dimension_numbers<[1], [0], [0], [1], [0, 0, 1, 1], [], []>} : vector<8x128xbf16>, vector<128x1024xbf16>, vector<8x1024xf32> -> vector<8x1024xf32>
      %102 = arith.addf %93, %101 : vector<8x1024xf32>
      %c0_91 = arith.constant 0 : index
      %c0_92 = arith.constant 0 : index
      %103 = vector.load %arg9[%c0_91, %c0_92] : memref<8x1024xf32, #tpu.memory_space<vmem>>, vector<8x1024xf32>
      tpu.vector_store %arg9[%c0_91, %c0_92], %102 {strides = array<i32>} : memref<8x1024xf32, #tpu.memory_space<vmem>>, vector<8x1024xf32>,
    }
    %c2_i32_19 = arith.constant 2 : i32
    %c0_20 = arith.constant 0 : index
    %c0_21 = arith.constant 0 : index
    %18 = vector.load %arg9[%c0_20, %c0_21] : memref<8x1024xf32, #tpu.memory_space<vmem>>, vector<8x1024xf32>
    %c0_22 = arith.constant 0 : index
    %c0_23 = arith.constant 0 : index
    %19 = vector.load %arg2[%c0_22, %c0_23] : memref<1x1024xf32, #tpu.memory_space<vmem>>, vector<1x1024xf32>
    %20 = vector.broadcast %19 : vector<1x1024xf32> to vector<8x1024xf32>
    %21 = arith.addf %18, %20 : vector<8x1024xf32>
    %cst_24 = arith.constant 0.000000e+00 : f32
    %22 = vector.broadcast %cst_24 : f32 to vector<8x1024xf32>
    %23 = arith.maximumf %21, %22 : vector<8x1024xf32>
    %24 = arith.truncf %23 : vector<8x1024xf32> to vector<8x1024xbf16>
    %c0_25 = arith.constant 0 : index
    %c0_26 = arith.constant 0 : index
    %25 = vector.load %arg10[%c0_25, %c0_26] : memref<8x1024xbf16, #tpu.memory_space<vmem>>, vector<8x1024xbf16>
    tpu.vector_store %arg10[%c0_25, %c0_26], %24 {strides = array<i32>} : memref<8x1024xbf16, #tpu.memory_space<vmem>>, vector<8x1024xbf16>,
    %cst_27 = arith.constant 0.000000e+00 : f32
    %26 = vector.broadcast %cst_27 : f32 to vector<8x1024xf32>
    %c0_28 = arith.constant 0 : index
    %c0_29 = arith.constant 0 : index
    %27 = vector.load %arg9[%c0_28, %c0_29] : memref<8x1024xf32, #tpu.memory_space<vmem>>, vector<8x1024xf32>
    tpu.vector_store %arg9[%c0_28, %c0_29], %26 {strides = array<i32>} : memref<8x1024xf32, #tpu.memory_space<vmem>>, vector<8x1024xf32>,
    %c0_i32_30 = arith.constant 0 : i32
    %c8_i32 = arith.constant 8 : i32
    %28 = arith.addi %c0_i32_30, %c8_i32 : i32
    %c1_i32_31 = arith.constant 1 : i32
    scf.for %arg18 = %c0_i32_30 to %28 step %c1_i32_31  : i32 {
      %c2_i32_72 = arith.constant 2 : i32
      %c0_i32_73 = arith.constant 0 : i32
      %74 = arith.cmpi eq, %c2_i32_72, %c0_i32_73 : i32
      %c1_i32_74 = arith.constant 1 : i32
      %75 = arith.select %74, %c1_i32_74, %c2_i32_72 : i32
      %76 = arith.remsi %arg18, %75 : i32
      %c0_i32_75 = arith.constant 0 : i32
      %77 = arith.cmpi ne, %76, %c0_i32_75 : i32
      %c0_i32_76 = arith.constant 0 : i32
      %78 = arith.cmpi slt, %76, %c0_i32_76 : i32
      %c0_i32_77 = arith.constant 0 : i32
      %79 = arith.cmpi slt, %75, %c0_i32_77 : i32
      %80 = arith.xori %78, %79 : i1
      %81 = arith.andi %80, %77 : i1
      %82 = arith.addi %76, %75 : i32
      %83 = arith.select %81, %82, %76 : i32
      %c0_i32_78 = arith.constant 0 : i32
      %c0_i32_79 = arith.constant 0 : i32
      %84 = tpu.memref_slice %arg6[%c0_i32_78, %c0_i32_79] : memref<1024x1024xbf16, #tpu.memory_space<any>> -> memref<128x1024xbf16, #tpu.memory_space<any>>
      %c0_i32_80 = arith.constant 0 : i32
      %c0_i32_81 = arith.constant 0 : i32
      %85 = tpu.memref_slice %arg13[%83, %c0_i32_80, %c0_i32_81] : memref<2x128x1024xbf16, #tpu.memory_space<vmem>> -> memref<1x128x1024xbf16, #tpu.memory_space<vmem>>
      %86 = tpu.memref_squeeze %85 : memref<1x128x1024xbf16, #tpu.memory_space<vmem>> -> memref<128x1024xbf16, #tpu.memory_space<vmem>>
      %87 = tpu.memref_slice %arg16[%83] : memref<2x!tpu.dma_semaphore, #tpu.memory_space<semaphore_mem>> -> memref<1x!tpu.dma_semaphore, #tpu.memory_space<semaphore_mem>>
      %88 = tpu.memref_squeeze %87 : memref<1x!tpu.dma_semaphore, #tpu.memory_space<semaphore_mem>> -> memref<!tpu.dma_semaphore, #tpu.memory_space<semaphore_mem>>
      tpu.wait_dma2 semaphore(%88 : memref<!tpu.dma_semaphore, #tpu.memory_space<semaphore_mem>>) src(%84 : memref<128x1024xbf16, #tpu.memory_space<any>>) dst(%86 : memref<128x1024xbf16, #tpu.memory_space<vmem>>)
      %c1_i32_82 = arith.constant 1 : i32
      %89 = arith.addi %arg18, %c1_i32_82 : i32
      %c8_i32_83 = arith.constant 8 : i32
      %90 = arith.cmpi slt, %89, %c8_i32_83 : i32
      %91 = arith.extui %90 : i1 to i32
      %c0_i32_84 = arith.constant 0 : i32
      %92 = arith.cmpi ne, %91, %c0_i32_84 : i32
      scf.if %92 {
        %c1_i32_93 = arith.constant 1 : i32
        %104 = arith.addi %arg18, %c1_i32_93 : i32
        %c1_i32_94 = arith.constant 1 : i32
        %105 = arith.subi %c1_i32_94, %83 : i32
        %c128_i32_95 = arith.constant 128 : i32
        %106 = arith.muli %104, %c128_i32_95 : i32
        %c0_i32_96 = arith.constant 0 : i32
        %107 = tpu.memref_slice %arg6[%106, %c0_i32_96] : memref<1024x1024xbf16, #tpu.memory_space<any>> -> memref<128x1024xbf16, #tpu.memory_space<any>>
        %c0_i32_97 = arith.constant 0 : i32
        %c0_i32_98 = arith.constant 0 : i32
        %108 = tpu.memref_slice %arg13[%105, %c0_i32_97, %c0_i32_98] : memref<2x128x1024xbf16, #tpu.memory_space<vmem>> -> memref<1x128x1024xbf16, #tpu.memory_space<vmem>>
        %109 = tpu.memref_squeeze %108 : memref<1x128x1024xbf16, #tpu.memory_space<vmem>> -> memref<128x1024xbf16, #tpu.memory_space<vmem>>
        %110 = tpu.memref_slice %arg16[%105] : memref<2x!tpu.dma_semaphore, #tpu.memory_space<semaphore_mem>> -> memref<1x!tpu.dma_semaphore, #tpu.memory_space<semaphore_mem>>
        %111 = tpu.memref_squeeze %110 : memref<1x!tpu.dma_semaphore, #tpu.memory_space<semaphore_mem>> -> memref<!tpu.dma_semaphore, #tpu.memory_space<semaphore_mem>>
        tpu.enqueue_dma source(%107 : memref<128x1024xbf16, #tpu.memory_space<any>>) target(%109 : memref<128x1024xbf16, #tpu.memory_space<vmem>>) target_semaphore(%111 : memref<!tpu.dma_semaphore, #tpu.memory_space<semaphore_mem>>)
      } else {
      }
      %c0_85 = arith.constant 0 : index
      %c0_86 = arith.constant 0 : index
      %93 = vector.load %arg9[%c0_85, %c0_86] : memref<8x1024xf32, #tpu.memory_space<vmem>>, vector<8x1024xf32>
      %c128_i32 = arith.constant 128 : i32
      %94 = arith.muli %arg18, %c128_i32 : i32
      %95 = tpu.assume_multiple %94, 128 : i32
      %c0_87 = arith.constant 0 : index
      %96 = arith.index_cast %95 : i32 to index
      %97 = vector.load %arg10[%c0_87, %96] : memref<8x1024xbf16, #tpu.memory_space<vmem>>, vector<8x128xbf16>
      %98 = arith.index_cast %83 : i32 to index
      %c0_88 = arith.constant 0 : index
      %c0_89 = arith.constant 0 : index
      %99 = vector.load %arg13[%98, %c0_88, %c0_89] : memref<2x128x1024xbf16, #tpu.memory_space<vmem>>, vector<1x128x1024xbf16>
      %100 = vector.shape_cast %99 : vector<1x128x1024xbf16> to vector<128x1024xbf16>
      %cst_90 = arith.constant dense<0.000000e+00> : vector<8x1024xf32>
      %101 = tpu.matmul %97, %100, %cst_90 {dimension_numbers = #tpu.dot_dimension_numbers<[1], [0], [0], [1], [0, 0, 1, 1], [], []>} : vector<8x128xbf16>, vector<128x1024xbf16>, vector<8x1024xf32> -> vector<8x1024xf32>
      %102 = arith.addf %93, %101 : vector<8x1024xf32>
      %c0_91 = arith.constant 0 : index
      %c0_92 = arith.constant 0 : index
      %103 = vector.load %arg9[%c0_91, %c0_92] : memref<8x1024xf32, #tpu.memory_space<vmem>>, vector<8x1024xf32>
      tpu.vector_store %arg9[%c0_91, %c0_92], %102 {strides = array<i32>} : memref<8x1024xf32, #tpu.memory_space<vmem>>, vector<8x1024xf32>,
    }
    %c8_i32_32 = arith.constant 8 : i32
    %c0_33 = arith.constant 0 : index
    %c0_34 = arith.constant 0 : index
    %29 = vector.load %arg9[%c0_33, %c0_34] : memref<8x1024xf32, #tpu.memory_space<vmem>>, vector<8x1024xf32>
    %c0_35 = arith.constant 0 : index
    %c0_36 = arith.constant 0 : index
    %30 = vector.load %arg3[%c0_35, %c0_36] : memref<1x1024xf32, #tpu.memory_space<vmem>>, vector<1x1024xf32>
    %31 = vector.broadcast %30 : vector<1x1024xf32> to vector<8x1024xf32>
    %32 = arith.addf %29, %31 : vector<8x1024xf32>
    %cst_37 = arith.constant 0.000000e+00 : f32
    %33 = vector.broadcast %cst_37 : f32 to vector<8x1024xf32>
    %34 = arith.maximumf %32, %33 : vector<8x1024xf32>
    %35 = arith.truncf %34 : vector<8x1024xf32> to vector<8x1024xbf16>
    %c0_38 = arith.constant 0 : index
    %c0_39 = arith.constant 0 : index
    %36 = vector.load %arg11[%c0_38, %c0_39] : memref<8x1024xbf16, #tpu.memory_space<vmem>>, vector<8x1024xbf16>
    tpu.vector_store %arg11[%c0_38, %c0_39], %35 {strides = array<i32>} : memref<8x1024xbf16, #tpu.memory_space<vmem>>, vector<8x1024xbf16>,
    %cst_40 = arith.constant 0.000000e+00 : f32
    %37 = vector.broadcast %cst_40 : f32 to vector<8x128xf32>
    %c0_41 = arith.constant 0 : index
    %c0_42 = arith.constant 0 : index
    %38 = vector.load %arg9[%c0_41, %c0_42] : memref<8x1024xf32, #tpu.memory_space<vmem>>, vector<8x128xf32>
    tpu.vector_store %arg9[%c0_41, %c0_42], %37 {strides = array<i32>} : memref<8x1024xf32, #tpu.memory_space<vmem>>, vector<8x128xf32>,
    %c0_i32_43 = arith.constant 0 : i32
    %c2_i32_44 = arith.constant 2 : i32
    %c0_i32_45 = arith.constant 0 : i32
    %39 = arith.cmpi eq, %c2_i32_44, %c0_i32_45 : i32
    %c1_i32_46 = arith.constant 1 : i32
    %40 = arith.select %39, %c1_i32_46, %c2_i32_44 : i32
    %41 = arith.remsi %c0_i32_43, %40 : i32
    %c0_i32_47 = arith.constant 0 : i32
    %42 = arith.cmpi ne, %41, %c0_i32_47 : i32
    %c0_i32_48 = arith.constant 0 : i32
    %43 = arith.cmpi slt, %41, %c0_i32_48 : i32
    %c0_i32_49 = arith.constant 0 : i32
    %44 = arith.cmpi slt, %40, %c0_i32_49 : i32
    %45 = arith.xori %43, %44 : i1
    %46 = arith.andi %45, %42 : i1
    %47 = arith.addi %41, %40 : i32
    %48 = arith.select %46, %47, %41 : i32
    %c0_i32_50 = arith.constant 0 : i32
    %c0_i32_51 = arith.constant 0 : i32
    %49 = tpu.memref_slice %arg7[%c0_i32_50, %c0_i32_51] : memref<1024x128xbf16, #tpu.memory_space<any>> -> memref<1024x128xbf16, #tpu.memory_space<any>>
    %c0_i32_52 = arith.constant 0 : i32
    %c0_i32_53 = arith.constant 0 : i32
    %50 = tpu.memref_slice %arg14[%48, %c0_i32_52, %c0_i32_53] : memref<2x1024x128xbf16, #tpu.memory_space<vmem>> -> memref<1x1024x128xbf16, #tpu.memory_space<vmem>>
    %51 = tpu.memref_squeeze %50 : memref<1x1024x128xbf16, #tpu.memory_space<vmem>> -> memref<1024x128xbf16, #tpu.memory_space<vmem>>
    %52 = tpu.memref_slice %arg17[%48] : memref<2x!tpu.dma_semaphore, #tpu.memory_space<semaphore_mem>> -> memref<1x!tpu.dma_semaphore, #tpu.memory_space<semaphore_mem>>
    %53 = tpu.memref_squeeze %52 : memref<1x!tpu.dma_semaphore, #tpu.memory_space<semaphore_mem>> -> memref<!tpu.dma_semaphore, #tpu.memory_space<semaphore_mem>>
    tpu.wait_dma2 semaphore(%53 : memref<!tpu.dma_semaphore, #tpu.memory_space<semaphore_mem>>) src(%49 : memref<1024x128xbf16, #tpu.memory_space<any>>) dst(%51 : memref<1024x128xbf16, #tpu.memory_space<vmem>>)
    %c1_i32_54 = arith.constant 1 : i32
    %54 = arith.addi %c0_i32_43, %c1_i32_54 : i32
    %c1_i32_55 = arith.constant 1 : i32
    %55 = arith.cmpi slt, %54, %c1_i32_55 : i32
    %56 = arith.extui %55 : i1 to i32
    %c0_i32_56 = arith.constant 0 : i32
    %57 = arith.cmpi ne, %56, %c0_i32_56 : i32
    scf.if %57 {
      %c1_i32_72 = arith.constant 1 : i32
      %74 = arith.addi %c0_i32_43, %c1_i32_72 : i32
      %c1_i32_73 = arith.constant 1 : i32
      %75 = arith.subi %c1_i32_73, %48 : i32
      %c1024_i32_74 = arith.constant 1024 : i32
      %76 = arith.muli %74, %c1024_i32_74 : i32
      %c0_i32_75 = arith.constant 0 : i32
      %77 = tpu.memref_slice %arg7[%76, %c0_i32_75] : memref<1024x128xbf16, #tpu.memory_space<any>> -> memref<1024x128xbf16, #tpu.memory_space<any>>
      %c0_i32_76 = arith.constant 0 : i32
      %c0_i32_77 = arith.constant 0 : i32
      %78 = tpu.memref_slice %arg14[%75, %c0_i32_76, %c0_i32_77] : memref<2x1024x128xbf16, #tpu.memory_space<vmem>> -> memref<1x1024x128xbf16, #tpu.memory_space<vmem>>
      %79 = tpu.memref_squeeze %78 : memref<1x1024x128xbf16, #tpu.memory_space<vmem>> -> memref<1024x128xbf16, #tpu.memory_space<vmem>>
      %80 = tpu.memref_slice %arg17[%75] : memref<2x!tpu.dma_semaphore, #tpu.memory_space<semaphore_mem>> -> memref<1x!tpu.dma_semaphore, #tpu.memory_space<semaphore_mem>>
      %81 = tpu.memref_squeeze %80 : memref<1x!tpu.dma_semaphore, #tpu.memory_space<semaphore_mem>> -> memref<!tpu.dma_semaphore, #tpu.memory_space<semaphore_mem>>
      tpu.enqueue_dma source(%77 : memref<1024x128xbf16, #tpu.memory_space<any>>) target(%79 : memref<1024x128xbf16, #tpu.memory_space<vmem>>) target_semaphore(%81 : memref<!tpu.dma_semaphore, #tpu.memory_space<semaphore_mem>>)
    } else {
    }
    %c0_57 = arith.constant 0 : index
    %c0_58 = arith.constant 0 : index
    %58 = vector.load %arg9[%c0_57, %c0_58] : memref<8x1024xf32, #tpu.memory_space<vmem>>, vector<8x128xf32>
    %c1024_i32 = arith.constant 1024 : i32
    %59 = arith.muli %c0_i32_43, %c1024_i32 : i32
    %60 = tpu.assume_multiple %59, 128 : i32
    %c0_59 = arith.constant 0 : index
    %61 = arith.index_cast %60 : i32 to index
    %62 = vector.load %arg11[%c0_59, %61] : memref<8x1024xbf16, #tpu.memory_space<vmem>>, vector<8x1024xbf16>
    %63 = arith.index_cast %48 : i32 to index
    %c0_60 = arith.constant 0 : index
    %c0_61 = arith.constant 0 : index
    %64 = vector.load %arg14[%63, %c0_60, %c0_61] : memref<2x1024x128xbf16, #tpu.memory_space<vmem>>, vector<1x1024x128xbf16>
    %65 = vector.shape_cast %64 : vector<1x1024x128xbf16> to vector<1024x128xbf16>
    %cst_62 = arith.constant dense<0.000000e+00> : vector<8x128xf32>
    %66 = tpu.matmul %62, %65, %cst_62 {dimension_numbers = #tpu.dot_dimension_numbers<[1], [0], [0], [1], [0, 0, 1, 1], [], []>} : vector<8x1024xbf16>, vector<1024x128xbf16>, vector<8x128xf32> -> vector<8x128xf32>
    %67 = arith.addf %58, %66 : vector<8x128xf32>
    %c0_63 = arith.constant 0 : index
    %c0_64 = arith.constant 0 : index
    %68 = vector.load %arg9[%c0_63, %c0_64] : memref<8x1024xf32, #tpu.memory_space<vmem>>, vector<8x128xf32>
    tpu.vector_store %arg9[%c0_63, %c0_64], %67 {strides = array<i32>} : memref<8x1024xf32, #tpu.memory_space<vmem>>, vector<8x128xf32>,
    %c1_i32_65 = arith.constant 1 : i32
    %c0_66 = arith.constant 0 : index
    %c0_67 = arith.constant 0 : index
    %69 = vector.load %arg9[%c0_66, %c0_67] : memref<8x1024xf32, #tpu.memory_space<vmem>>, vector<8x128xf32>
    %c0_68 = arith.constant 0 : index
    %c0_69 = arith.constant 0 : index
    %70 = vector.load %arg4[%c0_68, %c0_69] : memref<1x128xf32, #tpu.memory_space<vmem>>, vector<1x128xf32>
    %71 = vector.broadcast %70 : vector<1x128xf32> to vector<8x128xf32>
    %72 = arith.addf %69, %71 : vector<8x128xf32>
    %c0_70 = arith.constant 0 : index
    %c0_71 = arith.constant 0 : index
    %73 = vector.load %arg8[%c0_70, %c0_71] : memref<8x128xf32, #tpu.memory_space<vmem>>, vector<8x128xf32>
    tpu.vector_store %arg8[%c0_70, %c0_71], %72 {strides = array<i32>} : memref<8x128xf32, #tpu.memory_space<vmem>>, vector<8x128xf32>,
    return
  }
  func.func @transform_0(%arg0: i32) -> (i32, i32) {
    %c0_i32 = arith.constant 0 : i32
    %c0_i32_0 = arith.constant 0 : i32
    %c0_i32_1 = arith.constant 0 : i32
    return %c0_i32, %c0_i32_0 : i32, i32
  }
  func.func @transform_1(%arg0: i32) -> (i32, i32) {
    %c0_i32 = arith.constant 0 : i32
    %c0_i32_0 = arith.constant 0 : i32
    %c0_i32_1 = arith.constant 0 : i32
    return %c0_i32, %c0_i32_0 : i32, i32
  }
  func.func @transform_2(%arg0: i32) -> (i32, i32) {
    %c0_i32 = arith.constant 0 : i32
    %c0_i32_0 = arith.constant 0 : i32
    %c0_i32_1 = arith.constant 0 : i32
    return %c0_i32, %c0_i32_0 : i32, i32
  }
  func.func @transform_3(%arg0: i32) -> (i32, i32) {
    %c0_i32 = arith.constant 0 : i32
    %c0_i32_0 = arith.constant 0 : i32
    %c0_i32_1 = arith.constant 0 : i32
    return %c0_i32, %c0_i32_0 : i32, i32
  }
  func.func @transform_7(%arg0: i32) -> (i32, i32) {
    %c0_i32 = arith.constant 0 : i32
    %c0_i32_0 = arith.constant 0 : i32
    %c0_i32_1 = arith.constant 0 : i32
    return %c0_i32, %c0_i32_0 : i32, i32
  }
}

</mosaic_0001>

<bundles_post_ra>
// kernel: tpu_custom_call.1
= control target key start
LH: loop header
LB: loop body
LE: loop exit
PB: predicated region body
PF: predicated region fallthrough
CT: control target
= control target key end

     0   :  { %12 = vsyncpa [#allocation12], 0  ;;  %s3934_s0 = inlined_call_operand.hbm [shape: bf16[8,256], index: 0, kind: input, shape index: {}]   ;;  %s3935_s1 = inlined_call_operand.hbm [shape: f32[1,1024], index: 1, kind: input, shape index: {}]   ;;  %s3936_s2 = inlined_call_operand.hbm [shape: f32[1,1024], index: 2, kind: input, shape index: {}]   ;;  %s3937_s3 = inlined_call_operand.hbm [shape: f32[1,128], index: 3, kind: input, shape index: {}]   ;;  %s3938_s4 = inlined_call_operand.hbm [shape: bf16[256,1024], index: 4, kind: input, shape index: {}]   ;;  %s3939_s5 = inlined_call_operand.hbm [shape: bf16[1024,1024], index: 5, kind: input, shape index: {}]   ;;  %s3940_s6 = inlined_call_operand.hbm [shape: bf16[1024,128], index: 6, kind: input, shape index: {}]   ;;  %s3941_s7 = inlined_call_operand.hbm [shape: f32[8,128], index: 7, kind: output, shape index: {}]  }
   0x1   :  { %13 = vsyncpa [#allocation15], 0 }
   0x2   :  { %14 = vsyncpa [#allocation18], 0  ;;  %s32_s26 = sshll.u32 %s3935_s1, 4  ;;  %s33_s26 = int_to_ptr.hbm [resolvable:$true] %s32_s26 }
   0x3   :  { %15 = vsyncpa [#allocation13], 0  ;;  %s3440_s27 = smov [#allocation14]   ;;  %s21_s8 = sshll.u32 %s3934_s0, 4  ;;  %s22_s8 = int_to_ptr.hbm [resolvable:$true] %s21_s8 }
   0x4   :  { %s34_s28 = sshll.u32 %s3440_s27, 4  ;;  %s3441_s9 = smov [#allocation11]   ;;  %s35_s28 = int_to_ptr.vmem [resolvable:$true] %s34_s28 }
   0x5   :  { %37 = dma.hbm_to_vmem [thread:$0]  %s33_s26, 128, %s35_s28, [#allocation15]  }
   0x6   :  { %s23_s10 = sshll.u32 %s3441_s9, 4  ;;  %s43_s13 = sshll.u32 %s3936_s2, 4  ;;  %s24_s10 = int_to_ptr.vmem [resolvable:$true] %s23_s10  ;;  %s44_s13 = int_to_ptr.hbm [resolvable:$true] %s43_s13 }
   0x7   :  { %26 = dma.hbm_to_vmem [thread:$0]  %s22_s8, 128, %s24_s10, [#allocation12]  }
   0x8   :  { %s54_s15 = sshll.u32 %s3937_s3, 4  ;;  %s3442_s16 = smov [#allocation16]   ;;  %s55_s15 = int_to_ptr.hbm [resolvable:$true] %s54_s15 }
   0x9   :  { %s45_s17 = sshll.u32 %s3442_s16, 4  ;;  %s3443_s0 = smov [#allocation17]   ;;  %s46_s17 = int_to_ptr.vmem [resolvable:$true] %s45_s17 }
   0xa   :  { %48 = dma.hbm_to_vmem [thread:$0]  %s44_s13, 128, %s46_s17, [#allocation15]  }
   0xb   :  { %s56_s18 = sshll.u32 %s3443_s0, 4  ;;  %s57_s18 = int_to_ptr.vmem [resolvable:$true] %s56_s18 }
   0xc   :  { %59 = dma.hbm_to_vmem [thread:$0]  %s55_s15, 16, %s57_s18, [#allocation18]  }
   0xd   :  { %3418 = dma.done.wait [#allocation12], 128  }
   0xe   :  { %3419 = vsyncadd [#allocation12], 4294967168 }
   0xf   :  { %3420 = dma.done.wait [#allocation15], 256  }
  0x10   :  { %3421 = vsyncadd [#allocation15], 4294967040 }
  0x11   :  { %3422 = dma.done.wait [#allocation18], 16  }
  0x12   :  { %3423 = vsyncadd [#allocation18], 4294967280  ;;  %s83_s20 = sshll.u32 %s3938_s4, 4  ;;  %s3444_s3 = smov [#allocation5]   ;;  %v3445_v0 = vmov 0.0   ;;  %s84_s20 = int_to_ptr.hbm [resolvable:$true] %s83_s20 }
  0x13   :  { %s85_s21 = sshll.u32 %s3444_s3, 4  ;;  %115 = vst [vmem:[#allocation2 + $0x30] sm:$0xff] %v3445_v0  ;;  %s96_s24 = sshll.u32 %s3939_s5, 4  ;;  %s86_s21 = int_to_ptr.vmem [resolvable:$true] %s85_s21  ;;  %s97_s24 = int_to_ptr.hbm [resolvable:$true] %s96_s24 }
  0x14   :  { %116 = vst [vmem:[#allocation2] sm:$0xff] %v3445_v0  ;;  %88 = dma.hbm_to_vmem [thread:$0]  %s84_s20, 8192, %s86_s21, [#allocation8] }
  0x15   :  { %117 = vst [vmem:[#allocation2 + $0x18] sm:$0xff] %v3445_v0  ;;  %s3446_s25 = smov [#allocation6]   ;;  %s109_s29 = sshll.u32 %s3940_s6, 4  ;;  %s110_s29 = int_to_ptr.hbm [resolvable:$true] %s109_s29 }
  0x16   :  { %118 = vst [vmem:[#allocation2 + $0x10] sm:$0xff] %v3445_v0  ;;  %s98_s26 = sshll.u32 %s3446_s25, 4  ;;  %s3447_s30 = smov [#allocation7]   ;;  %s99_s26 = int_to_ptr.vmem [resolvable:$true] %s98_s26 }
  0x17   :  { %119 = vst [vmem:[#allocation2 + $0x8] sm:$0xff] %v3445_v0  ;;  %101 = dma.hbm_to_vmem [thread:$0]  %s97_s24, 8192, %s99_s26, [#allocation9] }
  0x18   :  { %120 = vst [vmem:[#allocation2 + $0x20] sm:$0xff] %v3445_v0  ;;  %s111_s8 = sshll.u32 %s3447_s30, 4  ;;  %s3520_s9 = smov 0   ;;  %s112_s8 = int_to_ptr.vmem [resolvable:$true] %s111_s8 }
  0x19   :  { %121 = vst [vmem:[#allocation2 + $0x28] sm:$0xff] %v3445_v0  ;;  %114 = dma.hbm_to_vmem [thread:$0]  %s110_s29, 8192, %s112_s8, [#allocation10] }
  0x1a   :  { %122 = vst [vmem:[#allocation2 + $0x38] sm:$0xff] %v3445_v0 }
  0x1b LB: > { %p129_p0 = scmp.lt.s32.totalorder %s3434_s9, 0  ;;  %s130_s6 = ssub.s32 0, %s3434_s9  ;;  %s3434_s9 = sphi %s3520_s9, %s3942_s9  }
  0x1c   : > { %s2128_s10 = smin.u32 %s3434_s9, %s130_s6 }
  0x1d   : > { %s132_s11 = sand.u32 1, %s2128_s10  }
  0x1e   : > { %s133_s12 = ssub.s32 0, %s132_s11 }
  0x1f   : > { %s3945_s12 = smov (!%p129_p0, %s133_s12), %s132_s11 }
  0x20   : > { %p2130_p1 = scmp.lt.s32.totalorder %s3945_s12, 0  ;;  %s139_s13 = sadd.s32 2, %s3945_s12 }
  0x22   : > { %s3947_s13 = smov (!%p2130_p1, %s139_s13), %s3945_s12 }
  0x23   : > { %s2928_s1 = sshll.u32 %s3947_s13, 9  ;;  %s144_s15 = scalar_lea.sflag [#allocation8], %s3947_s13 }
  0x24   : > { %s3528_s14 = scalar_lea.vmem [#allocation5], %s2928_s1 }
  0x25   : > { %3424 = dma.done.wait %s144_s15, 8192 }
  0x26   : > { %3425 = vsyncadd %s144_s15, 4294959104  ;;  %s3531_s16 = sadd.s32 1, %s3434_s9   ;;  %s154_s17 = ssub.s32 1, %s3947_s13 }
  0x27   : > { %p2133_p2 = scmp.ge.s32.totalorder %s3531_s16, 2  ;;  %p3134_p3 = scmp.lt.s32.totalorder %s3531_s16, 2 }
  0x28   : > { %s2929_s0 = sshll.u32 %s3434_s9, 7  ;;  %s2932_s18 = sshll.u32 %s154_s17, 9 }
  0x29   : > { %s2930_s2 = sadd.s32 128, %s2929_s0  ;;  %s163_s3 = scalar_lea.vmem [#allocation5], %s2932_s18 }
  0x2a   : > { %s156_s19 = sshra.s32 %s2930_s2, 3  ;;  %s3538_s21 = sshll.u32 %s163_s3, 4  ;;  %s175_s21 = int_to_ptr.vmem [resolvable:$true] %s3538_s21 }
  0x2b   : > { %s2931_s20 = sshll.u32 %s156_s19, 5  ;;  %s164_s26 = scalar_lea.sflag [#allocation8], %s154_s17 }
  0x2c   : > { %s160_s24 = scalar_lea.hbm %s3938_s4, %s2931_s20  ;;  %s3336_s8 = scalar_lea.hbm %s3938_s4, 1024 }
  0x2d   : > { %s3544_s25 = sshll.u32 %s160_s24, 4  ;;  %s173_s25 = int_to_ptr.hbm [resolvable:$true] %s3544_s25 }
  0x2e   : > { %s3330_s27 = sshra.s32 %s173_s25, 4  ;;  %s3331_s27 = int_to_ptr.hbm [resolvable:$true] %s3330_s27 }
  0x2f   : > { %s3332_s28 = scalar_lea.hbm %s3331_s27, 512  ;;  %p3337_p7 = scmp.lt.s32.totalorder %s3331_s27, %s3938_s4 }
  0x30   : > { %p3333_p4 = scmp.ne.s32.totalorder %s3331_s27, %s3332_s28  ;;  %p3338_p8 = scmp.lt.s32.totalorder %s3336_s8, %s3332_s28 }
  0x32   : > { %p3334_p5 = pnand %p3333_p4, %p3134_p3  ;;  %p3339_p9 = por %p3338_p8, %p3337_p7 }
  0x34   : > { %p3335_p6 = pneg %p3334_p5 }
  0x36   : > { %p3340_p10 = pnand %p3339_p9, %p3335_p6 }
  0x38   : > { %3343 = shalt.err (!%p3340_p10)  }
  0x39   : > { %s3344_s11 = sshra.s32 %s175_s21, 4  ;;  %s3448_s13 = smov [#allocation5]   ;;  %s3345_s11 = int_to_ptr.vmem [resolvable:$true] %s3344_s11 }
  0x3a   : > { %s3346_s12 = scalar_lea.vmem %s3345_s11, 512  ;;  %s3350_s1 = scalar_lea.vmem %s3448_s13, 1024 }
  0x3b   : > { %p3347_p11 = scmp.ne.s32.totalorder %s3345_s11, %s3346_s12  ;;  %p3351_p0 = scmp.lt.s32.totalorder %s3345_s11, [#allocation5] }
  0x3c   : > { %p3352_p1 = scmp.lt.s32.totalorder %s3350_s1, %s3346_s12 }
  0x3d   : > { %p3348_p12 = pnand %p3347_p11, %p3134_p3 }
  0x3e   : > { %p3353_p4 = por %p3352_p1, %p3351_p0 }
  0x3f   : > { %p3349_p13 = pneg %p3348_p12 }
  0x41   : > { %p3354_p5 = pnand %p3353_p4, %p3349_p13 }
  0x43   : > { %3357 = shalt.err (!%p3354_p5)  }
  0x44   : > { %3131 = dma.hbm_to_vmem [thread:$0]  (%p3134_p3), %s173_s25, 8192, %s175_s21, %s164_s26 }
  0x45   : > { %v2367_v1 = vld [vmem:[%s3528_s14 + $0x1c0] sm:$0xf]  ;;  %v2989_v3 = vld [vmem:[%s3528_s14 + $0x1c4] sm:$0xf]  ;;  %v2375_v6 = vld [vmem:[%s3528_s14 + $0x1c8] sm:$0xf] }
  0x46   : > { %v2993_v2 = vld [vmem:[%s3528_s14 + $0x1dc] sm:$0xf0]  ;;  %v2369_v5 = vld [vmem:[%s3528_s14 + $0x1e0] sm:$0xf0]  ;;  %v2994_v7 = vld [vmem:[%s3528_s14 + $0x1e4] sm:$0xf0] }
  0x47   : > { %v2368_v4 = vor.u32 %v2993_v2, %v2367_v1  ;;  %v2372_v8 = vor.u32 %v2989_v3, %v2369_v5  ;;  %v2376_v9 = vor.u32 %v2994_v7, %v2375_v6  ;;  %v2990_v10 = vld [vmem:[%s3528_s14 + $0x1cc] sm:$0xf]  ;;  %v2335_v12 = vld [vmem:[%s3528_s14 + $0x180] sm:$0xf]  ;;  %v2981_v15 = vld [vmem:[%s3528_s14 + $0x184] sm:$0xf] }
  0x48   : > { %v2377_v11 = vld [vmem:[%s3528_s14 + $0x1e8] sm:$0xf0]  ;;  %v2985_v14 = vld [vmem:[%s3528_s14 + $0x19c] sm:$0xf0]  ;;  %v2337_v16 = vld [vmem:[%s3528_s14 + $0x1a0] sm:$0xf0] }
  0x49   : > { %576 = vmatpush.bf16.msra.mxu0 %v2368_v4  ;;  %v2380_v13 = vor.u32 %v2990_v10, %v2377_v11  ;;  %589 = vmatpush.bf16.msra.mxu1 %v2372_v8  ;;  %v2336_v17 = vor.u32 %v2985_v14, %v2335_v12  ;;  %v2340_v18 = vor.u32 %v2981_v15, %v2337_v16  ;;  %v2343_v19 = vld [vmem:[%s3528_s14 + $0x188] sm:$0xf]  ;;  %v2982_v21 = vld [vmem:[%s3528_s14 + $0x18c] sm:$0xf]  ;;  %v2303_v24 = vld [vmem:[%s3528_s14 + $0x140] sm:$0xf] }
  0x4a   : > { %602 = vmatpush.bf16.msra.mxu2 %v2376_v9  ;;  %v2986_v20 = vld [vmem:[%s3528_s14 + $0x1a4] sm:$0xf0]  ;;  %v2345_v23 = vld [vmem:[%s3528_s14 + $0x1a8] sm:$0xf0]  ;;  %v2977_v25 = vld [vmem:[%s3528_s14 + $0x15c] sm:$0xf0] }
  0x4b   : > { %615 = vmatpush.bf16.msra.mxu3 %v2380_v13  ;;  %v2344_v22 = vor.u32 %v2986_v20, %v2343_v19  ;;  %v2348_v26 = vor.u32 %v2982_v21, %v2345_v23  ;;  %v2973_v27 = vld [vmem:[%s3528_s14 + $0x144] sm:$0xf]  ;;  %v2311_v29 = vld [vmem:[%s3528_s14 + $0x148] sm:$0xf]  ;;  %v2304_v30 = vor.u32 %v2977_v25, %v2303_v24  ;;  %v2974_v32 = vld [vmem:[%s3528_s14 + $0x14c] sm:$0xf] }
  0x4c   : > { %v2305_v28 = vld [vmem:[%s3528_s14 + $0x160] sm:$0xf0]  ;;  %v2978_v31 = vld [vmem:[%s3528_s14 + $0x164] sm:$0xf0]  ;;  %v2313_v33 = vld [vmem:[%s3528_s14 + $0x168] sm:$0xf0] }
  0x4d   : > { %577 = vmatpush.bf16.msra.mxu0 %v2336_v17  ;;  %590 = vmatpush.bf16.msra.mxu1 %v2340_v18  ;;  %v2308_v34 = vor.u32 %v2973_v27, %v2305_v28  ;;  %v2312_v35 = vor.u32 %v2978_v31, %v2311_v29  ;;  %v2271_v36 = vld [vmem:[%s3528_s14 + $0x100] sm:$0xf]  ;;  %v2965_v38 = vld [vmem:[%s3528_s14 + $0x104] sm:$0xf]  ;;  %v2316_v39 = vor.u32 %v2974_v32, %v2313_v33  ;;  %v2279_v41 = vld [vmem:[%s3528_s14 + $0x108] sm:$0xf] }
  0x4e   : > { %603 = vmatpush.bf16.msra.mxu2 %v2344_v22  ;;  %v2969_v37 = vld [vmem:[%s3528_s14 + $0x11c] sm:$0xf0]  ;;  %v2273_v40 = vld [vmem:[%s3528_s14 + $0x120] sm:$0xf0]  ;;  %v2970_v42 = vld [vmem:[%s3528_s14 + $0x124] sm:$0xf0] }
  0x4f   : > { %616 = vmatpush.bf16.msra.mxu3 %v2348_v26  ;;  %v2966_v43 = vld [vmem:[%s3528_s14 + $0x10c] sm:$0xf]  ;;  %v2272_v45 = vor.u32 %v2969_v37, %v2271_v36  ;;  %v2276_v46 = vor.u32 %v2965_v38, %v2273_v40  ;;  %v2280_v47 = vor.u32 %v2970_v42, %v2279_v41  ;;  %v2239_v48 = vld [vmem:[%s3528_s14 + $0xc0] sm:$0xf]  ;;  %v2957_v50 = vld [vmem:[%s3528_s14 + $0xc4] sm:$0xf] }
  0x50   : > { %v2281_v44 = vld [vmem:[%s3528_s14 + $0x128] sm:$0xf0]  ;;  %v2961_v49 = vld [vmem:[%s3528_s14 + $0xdc] sm:$0xf0]  ;;  %v2241_v52 = vld [vmem:[%s3528_s14 + $0xe0] sm:$0xf0] }
  0x51   : > { %578 = vmatpush.bf16.msra.mxu0 %v2304_v30  ;;  %591 = vmatpush.bf16.msra.mxu1 %v2308_v34  ;;  %v2284_v51 = vor.u32 %v2966_v43, %v2281_v44  ;;  %v2247_v53 = vld [vmem:[%s3528_s14 + $0xc8] sm:$0xf]  ;;  %v2958_v55 = vld [vmem:[%s3528_s14 + $0xcc] sm:$0xf]  ;;  %v2240_v57 = vor.u32 %v2961_v49, %v2239_v48  ;;  %v2244_v58 = vor.u32 %v2957_v50, %v2241_v52  ;;  %v2207_v60 = vld [vmem:[%s3528_s14 + $0x80] sm:$0xf] }
  0x52   : > { %604 = vmatpush.bf16.msra.mxu2 %v2312_v35  ;;  %v2962_v54 = vld [vmem:[%s3528_s14 + $0xe4] sm:$0xf0]  ;;  %v2249_v56 = vld [vmem:[%s3528_s14 + $0xe8] sm:$0xf0]  ;;  %v2953_v61 = vld [vmem:[%s3528_s14 + $0x9c] sm:$0xf0] }
  0x53   : > { %617 = vmatpush.bf16.msra.mxu3 %v2316_v39  ;;  %v2248_v59 = vor.u32 %v2962_v54, %v2247_v53  ;;  %v2949_v62 = vld [vmem:[%s3528_s14 + $0x84] sm:$0xf]  ;;  %v2252_v63 = vor.u32 %v2958_v55, %v2249_v56  ;;  %v2215_v2 = vld [vmem:[%s3528_s14 + $0x88] sm:$0xf]  ;;  %v2950_v4 = vld [vmem:[%s3528_s14 + $0x8c] sm:$0xf]  ;;  %v2208_v6 = vor.u32 %v2953_v61, %v2207_v60 }
  0x54   : > { %v2209_v1 = vld [vmem:[%s3528_s14 + $0xa0] sm:$0xf0]  ;;  %v2954_v3 = vld [vmem:[%s3528_s14 + $0xa4] sm:$0xf0]  ;;  %v2217_v5 = vld [vmem:[%s3528_s14 + $0xa8] sm:$0xf0] }
  0x55   : > { %579 = vmatpush.bf16.msra.mxu0 %v2272_v45  ;;  %592 = vmatpush.bf16.msra.mxu1 %v2276_v46  ;;  %s3613_s15 = sshra.s32 %s2929_s0, 7  ;;  %v2212_v7 = vor.u32 %v2949_v62, %v2209_v1  ;;  %v2216_v8 = vor.u32 %v2954_v3, %v2215_v2  ;;  %v2175_v9 = vld [vmem:[%s3528_s14 + $0x40] sm:$0xf]  ;;  %v2941_v11 = vld [vmem:[%s3528_s14 + $0x44] sm:$0xf]  ;;  %v2220_v12 = vor.u32 %v2950_v4, %v2217_v5  ;;  %s3721_s4 = smov (%p2133_p2), 0  }
  0x56   : > { %605 = vmatpush.bf16.msra.mxu2 %v2280_v47  ;;  %v2945_v10 = vld [vmem:[%s3528_s14 + $0x5c] sm:$0xf0]  ;;  %v2177_v13 = vld [vmem:[%s3528_s14 + $0x60] sm:$0xf0]  ;;  %v2183_v14 = vld [vmem:[%s3528_s14 + $0x48] sm:$0xf] }
  0x57   : > { %618 = vmatpush.bf16.msra.mxu3 %v2284_v51  ;;  %v2946_v15 = vld [vmem:[%s3528_s14 + $0x64] sm:$0xf0]  ;;  %v2942_v16 = vld [vmem:[%s3528_s14 + $0x4c] sm:$0xf]  ;;  %s2140_s9 = sshll.u32 %s3613_s15, 2  ;;  %v2176_v18 = vor.u32 %v2945_v10, %v2175_v9  ;;  %v2180_v21 = vor.u32 %v2941_v11, %v2177_v13 }
  0x58   : > { %v2185_v17 = vld [vmem:[%s3528_s14 + $0x68] sm:$0xf0]  ;;  %v2143_v19 = vld [vmem:[%s3528_s14] sm:$0xf]  ;;  %v2184_v22 = vor.u32 %v2946_v15, %v2183_v14  ;;  %v2933_v23 = vld [vmem:[%s3528_s14 + $0x4] sm:$0xf] }
  0x59   : > { %580 = vmatpush.bf16.msra.mxu0 %v2240_v57  ;;  %593 = vmatpush.bf16.msra.mxu1 %v2244_v58  ;;  %v2937_v20 = vld [vmem:[%s3528_s14 + $0x1c] sm:$0xf0]  ;;  %v2145_v24 = vld [vmem:[%s3528_s14 + $0x20] sm:$0xf0]  ;;  %v2151_v25 = vld [vmem:[%s3528_s14 + $0x8] sm:$0xf]  ;;  %v2188_v26 = vor.u32 %v2942_v16, %v2185_v17 }
  0x5a   : > { %606 = vmatpush.bf16.msra.mxu2 %v2248_v59  ;;  %v2938_v27 = vld [vmem:[%s3528_s14 + $0x24] sm:$0xf0]  ;;  %v2934_v28 = vld [vmem:[%s3528_s14 + $0xc] sm:$0xf]  ;;  %v2383_v30 = vld [vmem:[%s3528_s14 + $0x1d0] sm:$0xf]  ;;  %v2144_v33 = vor.u32 %v2937_v20, %v2143_v19  ;;  %v2148_v37 = vor.u32 %v2933_v23, %v2145_v24 }
  0x5b   : > { %619 = vmatpush.bf16.msra.mxu3 %v2252_v63  ;;  %v2153_v29 = vld [vmem:[%s3528_s14 + $0x28] sm:$0xf0]  ;;  %v2995_v31 = vld [vmem:[%s3528_s14 + $0x1ec] sm:$0xf0]  ;;  %v2991_v32 = vld [vmem:[%s3528_s14 + $0x1d4] sm:$0xf]  ;;  %v2152_v38 = vor.u32 %v2938_v27, %v2151_v25 }
  0x5c   : > { %v2385_v34 = vld [vmem:[%s3528_s14 + $0x1f0] sm:$0xf0]  ;;  %v2391_v35 = vld [vmem:[%s3528_s14 + $0x1d8] sm:$0xf]  ;;  %v2992_v39 = vld [vmem:[%s3528_s14 + $0x1dc] sm:$0xf]  ;;  %v2156_v41 = vor.u32 %v2934_v28, %v2153_v29  ;;  %v2384_v42 = vor.u32 %v2995_v31, %v2383_v30 }
  0x5d   : > { %581 = vmatpush.bf16.msra.mxu0 %v2208_v6  ;;  %594 = vmatpush.bf16.msra.mxu1 %v2212_v7  ;;  %v2996_v36 = vld [vmem:[%s3528_s14 + $0x1f4] sm:$0xf0]  ;;  %v2393_v40 = vld [vmem:[%s3528_s14 + $0x1f8] sm:$0xf0]  ;;  %v2388_v43 = vor.u32 %v2991_v32, %v2385_v34  ;;  %v2351_v45 = vld [vmem:[%s3528_s14 + $0x190] sm:$0xf] }
  0x5e   : > { %607 = vmatpush.bf16.msra.mxu2 %v2216_v8  ;;  %v2392_v44 = vor.u32 %v2996_v36, %v2391_v35  ;;  %v2987_v46 = vld [vmem:[%s3528_s14 + $0x1ac] sm:$0xf0]  ;;  %v2983_v47 = vld [vmem:[%s3528_s14 + $0x194] sm:$0xf]  ;;  %v2396_v48 = vor.u32 %v2992_v39, %v2393_v40  ;;  %v2359_v50 = vld [vmem:[%s3528_s14 + $0x198] sm:$0xf] }
  0x5f   : > { %620 = vmatpush.bf16.msra.mxu3 %v2220_v12  ;;  %v2353_v49 = vld [vmem:[%s3528_s14 + $0x1b0] sm:$0xf0]  ;;  %v2988_v51 = vld [vmem:[%s3528_s14 + $0x1b4] sm:$0xf0]  ;;  %s190_s17 = scalar_lea.vmem [#allocation11], %s2140_s9  ;;  %v2352_v55 = vor.u32 %v2987_v46, %v2351_v45  ;;  %s3942_s9 = smov %s3531_s16 }
  0x60   : > { %v3648_v52 = vld [vmem:[%s190_s17] sm:$0xf]  ;;  %v2984_v53 = vld [vmem:[%s3528_s14 + $0x19c] sm:$0xf]  ;;  %v2356_v56 = vor.u32 %v2983_v47, %v2353_v49  ;;  %v2360_v57 = vor.u32 %v2988_v51, %v2359_v50  ;;  %v2319_v58 = vld [vmem:[%s3528_s14 + $0x150] sm:$0xf] }
  0x61   : > { %582 = vmatpush.bf16.msra.mxu0 %v2176_v18  ;;  %595 = vmatpush.bf16.msra.mxu1 %v2180_v21  ;;  %v2361_v54 = vld [vmem:[%s3528_s14 + $0x1b8] sm:$0xf0]  ;;  %v2979_v59 = vld [vmem:[%s3528_s14 + $0x16c] sm:$0xf0]  ;;  %v2975_v60 = vld [vmem:[%s3528_s14 + $0x154] sm:$0xf] }
  0x62   : > { %608 = vmatpush.bf16.msra.mxu2 %v2184_v22  ;;  %v2364_v61 = vor.u32 %v2984_v53, %v2361_v54  ;;  %v2321_v62 = vld [vmem:[%s3528_s14 + $0x170] sm:$0xf0]  ;;  %v2327_v63 = vld [vmem:[%s3528_s14 + $0x158] sm:$0xf]  ;;  %v2976_v2 = vld [vmem:[%s3528_s14 + $0x15c] sm:$0xf]  ;;  %v2320_v4 = vor.u32 %v2979_v59, %v2319_v58 }
  0x63   : > { %621 = vmatpush.bf16.msra.mxu3 %v2188_v26  ;;  %v2980_v1 = vld [vmem:[%s3528_s14 + $0x174] sm:$0xf0]  ;;  %v2329_v3 = vld [vmem:[%s3528_s14 + $0x178] sm:$0xf0]  ;;  %v2324_v5 = vor.u32 %v2975_v60, %v2321_v62  ;;  %v2287_v7 = vld [vmem:[%s3528_s14 + $0x110] sm:$0xf] }
  0x64   : > { %v2328_v6 = vor.u32 %v2980_v1, %v2327_v63  ;;  %v2971_v8 = vld [vmem:[%s3528_s14 + $0x12c] sm:$0xf0]  ;;  %v2967_v9 = vld [vmem:[%s3528_s14 + $0x114] sm:$0xf]  ;;  %v2332_v10 = vor.u32 %v2976_v2, %v2329_v3  ;;  %v2295_v12 = vld [vmem:[%s3528_s14 + $0x118] sm:$0xf] }
  0x65   : > { %583 = vmatpush.bf16.msra.mxu0 %v2144_v33  ;;  %596 = vmatpush.bf16.msra.mxu1 %v2148_v37  ;;  %v2289_v11 = vld [vmem:[%s3528_s14 + $0x130] sm:$0xf0]  ;;  %v2972_v13 = vld [vmem:[%s3528_s14 + $0x134] sm:$0xf0]  ;;  %v2968_v14 = vld [vmem:[%s3528_s14 + $0x11c] sm:$0xf]  ;;  %v2288_v16 = vor.u32 %v2971_v8, %v2287_v7 }
  0x66   : > { %609 = vmatpush.bf16.msra.mxu2 %v2152_v38  ;;  %v2297_v15 = vld [vmem:[%s3528_s14 + $0x138] sm:$0xf0]  ;;  %v2292_v17 = vor.u32 %v2967_v9, %v2289_v11  ;;  %v2296_v18 = vor.u32 %v2972_v13, %v2295_v12  ;;  %v2255_v19 = vld [vmem:[%s3528_s14 + $0xd0] sm:$0xf]  ;;  %v2959_v21 = vld [vmem:[%s3528_s14 + $0xd4] sm:$0xf] }
  0x67   : > { %622 = vmatpush.bf16.msra.mxu3 %v2156_v41  ;;  %v2963_v20 = vld [vmem:[%s3528_s14 + $0xec] sm:$0xf0]  ;;  %v2300_v22 = vor.u32 %v2968_v14, %v2297_v15  ;;  %v2257_v23 = vld [vmem:[%s3528_s14 + $0xf0] sm:$0xf0]  ;;  %v2263_v24 = vld [vmem:[%s3528_s14 + $0xd8] sm:$0xf] }
  0x68   : > { %584 = vmatmul.bf16.vlgmr.msra.gmra.mxu0 %v3648_v52  ;;  %597 = vmatmul.bf16.vlgmr.msra.gmra.mxu1 %v3648_v52  ;;  %v2964_v25 = vld [vmem:[%s3528_s14 + $0xf4] sm:$0xf0]  ;;  %v2960_v26 = vld [vmem:[%s3528_s14 + $0xdc] sm:$0xf]  ;;  %v2256_v28 = vor.u32 %v2963_v20, %v2255_v19  ;;  %v2260_v29 = vor.u32 %v2959_v21, %v2257_v23  ;;  %v2223_v31 = vld [vmem:[%s3528_s14 + $0x90] sm:$0xf] }
  0x69   : > { %628 = vmatpush.bf16.msrb.mxu0 %v2384_v42  ;;  %641 = vmatpush.bf16.msrb.mxu1 %v2388_v43  ;;  %v2265_v27 = vld [vmem:[%s3528_s14 + $0xf8] sm:$0xf0]  ;;  %v2264_v30 = vor.u32 %v2964_v25, %v2263_v24  ;;  %v2955_v32 = vld [vmem:[%s3528_s14 + $0xac] sm:$0xf0]  ;;  %v2951_v33 = vld [vmem:[%s3528_s14 + $0x94] sm:$0xf] }
  0x6a   : > { %654 = vmatpush.bf16.msrb.mxu2 %v2392_v44  ;;  %623 = vmatmul.bf16.vlgmr.msra.gmra.mxu3 %v3648_v52  ;;  %v2268_v34 = vor.u32 %v2960_v26, %v2265_v27  ;;  %v2225_v35 = vld [vmem:[%s3528_s14 + $0xb0] sm:$0xf0]  ;;  %v2231_v36 = vld [vmem:[%s3528_s14 + $0x98] sm:$0xf]  ;;  %v2952_v38 = vld [vmem:[%s3528_s14 + $0x9c] sm:$0xf]  ;;  %v2224_v40 = vor.u32 %v2955_v32, %v2223_v31 }
  0x6b   : > { %667 = vmatpush.bf16.msrb.mxu3 %v2396_v48  ;;  %610 = vmatmul.bf16.vlgmr.msra.gmra.mxu2 %v3648_v52  ;;  %v2956_v37 = vld [vmem:[%s3528_s14 + $0xb4] sm:$0xf0]  ;;  %v2233_v39 = vld [vmem:[%s3528_s14 + $0xb8] sm:$0xf0]  ;;  %v2228_v41 = vor.u32 %v2951_v33, %v2225_v35  ;;  %v2191_v43 = vld [vmem:[%s3528_s14 + $0x50] sm:$0xf] }
  0x6c   : > { %v2232_v42 = vor.u32 %v2956_v37, %v2231_v36  ;;  %v2947_v44 = vld [vmem:[%s3528_s14 + $0x6c] sm:$0xf0]  ;;  %v2943_v45 = vld [vmem:[%s3528_s14 + $0x54] sm:$0xf]  ;;  %v2236_v46 = vor.u32 %v2952_v38, %v2233_v39  ;;  %v2199_v48 = vld [vmem:[%s3528_s14 + $0x58] sm:$0xf] }
  0x6d   : > { %629 = vmatpush.bf16.msrb.mxu0 %v2352_v55  ;;  %642 = vmatpush.bf16.msrb.mxu1 %v2356_v56  ;;  %v2193_v47 = vld [vmem:[%s3528_s14 + $0x70] sm:$0xf0]  ;;  %v2948_v49 = vld [vmem:[%s3528_s14 + $0x74] sm:$0xf0]  ;;  %v2944_v50 = vld [vmem:[%s3528_s14 + $0x5c] sm:$0xf]  ;;  %v2192_v53 = vor.u32 %v2947_v44, %v2191_v43 }
  0x6e   : > { %655 = vmatpush.bf16.msrb.mxu2 %v2360_v57  ;;  %v2201_v51 = vld [vmem:[%s3528_s14 + $0x78] sm:$0xf0]  ;;  %v2196_v54 = vor.u32 %v2943_v45, %v2193_v47  ;;  %v2200_v55 = vor.u32 %v2948_v49, %v2199_v48  ;;  %v2159_v56 = vld [vmem:[%s3528_s14 + $0x10] sm:$0xf]  ;;  %v2935_v58 = vld [vmem:[%s3528_s14 + $0x14] sm:$0xf] }
  0x6f   : > { %668 = vmatpush.bf16.msrb.mxu3 %v2364_v61  ;;  %v2939_v57 = vld [vmem:[%s3528_s14 + $0x2c] sm:$0xf0]  ;;  %v2204_v59 = vor.u32 %v2944_v50, %v2201_v51  ;;  %v2161_v60 = vld [vmem:[%s3528_s14 + $0x30] sm:$0xf0]  ;;  %v2167_v61 = vld [vmem:[%s3528_s14 + $0x18] sm:$0xf] }
  0x70   : > { %v2940_v62 = vld [vmem:[%s3528_s14 + $0x34] sm:$0xf0]  ;;  %v2936_v63 = vld [vmem:[%s3528_s14 + $0x1c] sm:$0xf]  ;;  %v2160_v2 = vor.u32 %v2939_v57, %v2159_v56  ;;  %v2164_v3 = vor.u32 %v2935_v58, %v2161_v60  ;;  %v179_v7 = vld [vmem:[#allocation2] sm:$0xff] }
  0x71   : > { %630 = vmatpush.bf16.msrb.mxu0 %v2320_v4  ;;  %643 = vmatpush.bf16.msrb.mxu1 %v2324_v5  ;;  %v2169_v1 = vld [vmem:[%s3528_s14 + $0x38] sm:$0xf0]  ;;  %v2168_v4 = vor.u32 %v2940_v62, %v2167_v61  ;;  %v181_v13 = vld [vmem:[#allocation2 + $0x10] sm:$0xff]  ;;  %v182_v21 = vld [vmem:[#allocation2 + $0x8] sm:$0xff] }
  0x72   : > { %656 = vmatpush.bf16.msrb.mxu2 %v2328_v6  ;;  %v2172_v5 = vor.u32 %v2936_v63, %v2169_v1  ;;  %v178_v6 = vld [vmem:[#allocation2 + $0x30] sm:$0xff]  ;;  %v180_v12 = vld [vmem:[#allocation2 + $0x18] sm:$0xff]  ;;  %v184_v27 = vld [vmem:[#allocation2 + $0x28] sm:$0xff] }
  0x73   : > { %669 = vmatpush.bf16.msrb.mxu3 %v2332_v10  ;;  %v704_v39 = vld [vmem:[#allocation14] sm:$0xff] (%p2133_p2) }
  0x74   :  { %v708_v44 = vperm.slane (%p2133_p2), %v704_v39, 2  ;;  %v709_v45 = vperm.slane (%p2133_p2), %v704_v39, 3  ;;  %v710_v48 = vperm.slane (%p2133_p2), %v704_v39, 4  ;;  %v711_v49 = vperm.slane (%p2133_p2), %v704_v39, 5 }
  0x75   : > { %631 = vmatpush.bf16.msrb.mxu0 %v2288_v16  ;;  %644 = vmatpush.bf16.msrb.mxu1 %v2292_v17  ;;  %v712_v56 = vperm.slane (%p2133_p2), %v704_v39, 6  ;;  %v713_v60 = vperm.slane (%p2133_p2), %v704_v39, 7 }
  0x76   : > { %657 = vmatpush.bf16.msrb.mxu2 %v2296_v18 }
  0x77   : > { %670 = vmatpush.bf16.msrb.mxu3 %v2300_v22  ;;  %v183_v22 = vld [vmem:[#allocation2 + $0x20] sm:$0xff] }
  0x79   : > { %632 = vmatpush.bf16.msrb.mxu0 %v2256_v28  ;;  %645 = vmatpush.bf16.msrb.mxu1 %v2260_v29  ;;  %v185_v28 = vld [vmem:[#allocation2 + $0x38] sm:$0xff] }
  0x7a   : > { %658 = vmatpush.bf16.msrb.mxu2 %v2264_v30 }
  0x7b   : > { %671 = vmatpush.bf16.msrb.mxu3 %v2268_v34 }
  0x7d   : > { %633 = vmatpush.bf16.msrb.mxu0 %v2224_v40  ;;  %646 = vmatpush.bf16.msrb.mxu1 %v2228_v41  ;;  %v706_v40 = vperm.slane (%p2133_p2), %v704_v39, 0  ;;  %v707_v41 = vperm.slane (%p2133_p2), %v704_v39, 1 }
  0x7e   : > { %659 = vmatpush.bf16.msrb.mxu2 %v2232_v42 }
  0x7f   : > { %672 = vmatpush.bf16.msrb.mxu3 %v2236_v46 }
  0x81   : > { %634 = vmatpush.bf16.msrb.mxu0 %v2192_v53  ;;  %647 = vmatpush.bf16.msrb.mxu1 %v2196_v54 }
  0x82   : > { %660 = vmatpush.bf16.msrb.mxu2 %v2200_v55 }
  0x83   : > { %673 = vmatpush.bf16.msrb.mxu3 %v2204_v59 }
  0x85   : > { %635 = vmatpush.bf16.msrb.mxu0 %v2160_v2  ;;  %648 = vmatpush.bf16.msrb.mxu1 %v2164_v3 }
  0x86   : > { %661 = vmatpush.bf16.msrb.mxu2 %v2168_v4 }
  0x87   : > { %674 = vmatpush.bf16.msrb.mxu3 %v2172_v5 }
  0x88   : > { %636 = vmatmul.bf16.vlgmr.msrb.gmra.mxu0 %v3648_v52  ;;  %649 = vmatmul.bf16.vlgmr.msrb.gmra.mxu1 %v3648_v52 }
  0x89   : > { %662 = vmatmul.bf16.vlgmr.msrb.gmra.mxu2 %v3648_v52 }
  0x8a   : > { %675 = vmatmul.bf16.vlgmr.msrb.gmra.mxu3 %v3648_v52 }
  0xe5   : > { %v585_v8 = vpop.f32.mrf.mxu0  ;;  %v598_v10 = vpop.f32.mrf.mxu1 }
  0xe6   : > { %v680_v9 = vadd.f32 %v585_v8, %v178_v6  ;;  %v681_v11 = vadd.f32 %v598_v10, %v179_v7 }
  0xe8   : > { %688 = vst [vmem:[#allocation2 + $0x30] sm:$0xff] %v680_v9 }
  0xe9   : > { %689 = vst [vmem:[#allocation2] sm:$0xff] %v681_v11 }
  0xed   : > { %v624_v16 = vpop.f32.mrf.mxu3  ;;  %v587_v18 = vpop.f32.mrf.mxu0 }
  0xee   : > { %v611_v14 = vpop.f32.mrf.mxu2  ;;  %v683_v17 = vadd.f32 %v624_v16, %v181_v13  ;;  %v600_v19 = vpop.f32.mrf.mxu1 }
  0xef   : > { %v682_v15 = vadd.f32 %v611_v14, %v180_v12  ;;  %v696_v37 = vld [vmem:[#allocation2 + $0x30] sm:$0xff] (%p2133_p2) }
  0xf0   : > { %691 = vst [vmem:[#allocation2 + $0x10] sm:$0xff] %v683_v17  ;;  %v697_v38 = vld [vmem:[#allocation2] sm:$0xff] (%p2133_p2)  ;;  %v722_v50 = vadd.f32 (%p2133_p2), %v706_v40, %v696_v37 }
  0xf1   : > { %690 = vst [vmem:[#allocation2 + $0x18] sm:$0xff] %v682_v15  ;;  %v723_v51 = vadd.f32 (%p2133_p2), %v707_v41, %v697_v38 }
  0xf2   :  { %746 = vst [vmem:[#allocation2 + $0x30] sm:$0xff] (%p2133_p2), %v3445_v0  ;;  %v730_v61 = vmax.f32 (%p2133_p2), %v722_v50, 0.0 }
  0xf3   :  { %747 = vst [vmem:[#allocation2] sm:$0xff] (%p2133_p2), %v3445_v0  ;;  %v731_v62 = vmax.f32 (%p2133_p2), %v723_v51, 0.0 }
  0xf5   : > { %v626_v52 = vpop.f32.mrf.mxu3  ;;  %v738_v6 = vpack.c.bf16 (%p2133_p2), %v731_v62, %v730_v61 }
  0xf6   : > { %v613_v20 = vpop.f32.mrf.mxu2 }
  0xf7   :  { %v699_v43 = vld [vmem:[#allocation2 + $0x10] sm:$0xff] (%p2133_p2)  ;;  %742 = vst [vmem:[#allocation3] sm:$0xff] (%p2133_p2), %v738_v6 }
  0xf8   :  { %v698_v42 = vld [vmem:[#allocation2 + $0x18] sm:$0xff] (%p2133_p2)  ;;  %v725_v57 = vadd.f32 (%p2133_p2), %v709_v45, %v699_v43  ;;  %749 = vst [vmem:[#allocation2 + $0x10] sm:$0xff] (%p2133_p2), %v3445_v0 }
  0xf9   :  { %v724_v53 = vadd.f32 (%p2133_p2), %v708_v44, %v698_v42  ;;  %748 = vst [vmem:[#allocation2 + $0x18] sm:$0xff] (%p2133_p2), %v3445_v0 }
  0xfa   :  { %v733_v2 = vmax.f32 (%p2133_p2), %v725_v57, 0.0 }
  0xfb   :  { %v732_v63 = vmax.f32 (%p2133_p2), %v724_v53, 0.0 }
  0xfd   :  { %v739_v8 = vpack.c.bf16 (%p2133_p2), %v733_v2, %v732_v63 }
  0xff   :  { %743 = vst [vmem:[#allocation3 + $0x8] sm:$0xff] (%p2133_p2), %v739_v8 }
 0x105   : > { %v637_v23 = vpop.f32.mrf.mxu0  ;;  %v650_v25 = vpop.f32.mrf.mxu1 }
 0x106   : > { %v684_v24 = vadd.f32 %v637_v23, %v182_v21  ;;  %v685_v26 = vadd.f32 %v650_v25, %v183_v22 }
 0x108   : > { %692 = vst [vmem:[#allocation2 + $0x8] sm:$0xff] %v684_v24 }
 0x109   : > { %693 = vst [vmem:[#allocation2 + $0x20] sm:$0xff] %v685_v26 }
 0x10c   : > { %v663_v29 = vpop.f32.mrf.mxu2 }
 0x10d   : > { %v686_v30 = vadd.f32 %v663_v29, %v184_v27  ;;  %v676_v31 = vpop.f32.mrf.mxu3  ;;  %v639_v32 = vpop.f32.mrf.mxu0 }
 0x10e   : > { %v687_v33 = vadd.f32 %v676_v31, %v185_v28  ;;  %v652_v34 = vpop.f32.mrf.mxu1 }
 0x10f   : > { %694 = vst [vmem:[#allocation2 + $0x28] sm:$0xff] %v686_v30  ;;  %v700_v46 = vld [vmem:[#allocation2 + $0x8] sm:$0xff] (%p2133_p2) }
 0x110   : > { %695 = vst [vmem:[#allocation2 + $0x38] sm:$0xff] %v687_v33  ;;  %v701_v47 = vld [vmem:[#allocation2 + $0x20] sm:$0xff] (%p2133_p2)  ;;  %v726_v58 = vadd.f32 (%p2133_p2), %v710_v48, %v700_v46 }
 0x111   :  { %127 = sbr.rel (!%p2133_p2) target bundleno = 27 (0x1b), region = 109  ;;  %v727_v59 = vadd.f32 (%p2133_p2), %v711_v49, %v701_v47  ;;  %750 = vst [vmem:[#allocation2 + $0x8] sm:$0xff] (%p2133_p2), %v3445_v0 }
 0x112   :  { %v734_v3 = vmax.f32 (%p2133_p2), %v726_v58, 0.0  ;;  %751 = vst [vmem:[#allocation2 + $0x20] sm:$0xff] (%p2133_p2), %v3445_v0 }
 0x113   :  { %v735_v4 = vmax.f32 (%p2133_p2), %v727_v59, 0.0 }
 0x114   : > { %v665_v35 = vpop.f32.mrf.mxu2 }
 0x115   : > { %v678_v36 = vpop.f32.mrf.mxu3  ;;  %v740_v9 = vpack.c.bf16 (%p2133_p2), %v735_v4, %v734_v3 }
 0x116   :  { %v702_v54 = vld [vmem:[#allocation2 + $0x28] sm:$0xff] }
 0x117   :  { %v703_v55 = vld [vmem:[#allocation2 + $0x38] sm:$0xff]  ;;  %v728_v1 = vadd.f32 %v712_v56, %v702_v54  ;;  %752 = vst [vmem:[#allocation2 + $0x28] sm:$0xff] %v3445_v0 }
 0x118   :  { %v729_v5 = vadd.f32 %v713_v60, %v703_v55  ;;  %753 = vst [vmem:[#allocation2 + $0x38] sm:$0xff] %v3445_v0 }
 0x119   :  { %v736_v7 = vmax.f32 %v728_v1, 0.0  ;;  %744 = vst [vmem:[#allocation3 + $0x10] sm:$0xff] %v740_v9 }
 0x11a   :  { %v737_v10 = vmax.f32 %v729_v5, 0.0 }
 0x11c   :  { %v741_v11 = vpack.c.bf16 %v737_v10, %v736_v7 }
 0x11e   :  { %745 = vst [vmem:[#allocation3 + $0x18] sm:$0xff] %v741_v11 }
 0x11f LB: > { %p760_p2 = scmp.lt.s32.totalorder %s3438_s4, 0  ;;  %s761_s14 = ssub.s32 0, %s3438_s4  ;;  %s3438_s4 = sphi %s3721_s4, %s3943_s4  }
 0x120   : > { %s2397_s16 = smin.u32 %s3438_s4, %s761_s14 }
 0x121   : > { %s763_s0 = sand.u32 1, %s2397_s16  }
 0x122   : > { %s764_s18 = ssub.s32 0, %s763_s0 }
 0x123   : > { %s3949_s18 = smov (!%p760_p2, %s764_s18), %s763_s0 }
 0x124   : > { %p2399_p3 = scmp.lt.s32.totalorder %s3949_s18, 0  ;;  %s770_s2 = sadd.s32 2, %s3949_s18 }
 0x126   : > { %s3951_s2 = smov (!%p2399_p3, %s770_s2), %s3949_s18 }
 0x127   : > { %s2997_s19 = sshll.u32 %s3951_s2, 9  ;;  %s775_s3 = scalar_lea.sflag [#allocation9], %s3951_s2 }
 0x128   : > { %s3729_s20 = scalar_lea.vmem [#allocation6], %s2997_s19 }
 0x129   : > { %3426 = dma.done.wait %s775_s3, 8192 }
 0x12a   : > { %3427 = vsyncadd %s775_s3, 4294959104  ;;  %s3732_s21 = sadd.s32 1, %s3438_s4   ;;  %s785_s22 = ssub.s32 1, %s3951_s2 }
 0x12b   : > { %p2402_p6 = scmp.ge.s32.totalorder %s3732_s21, 8  ;;  %p3135_p7 = scmp.lt.s32.totalorder %s3732_s21, 8 }
 0x12c   : > { %s2998_s23 = sshll.u32 %s3438_s4, 7  ;;  %s3001_s24 = sshll.u32 %s785_s22, 9 }
 0x12d   : > { %s2999_s25 = sadd.s32 128, %s2998_s23  ;;  %s794_s28 = scalar_lea.vmem [#allocation6], %s3001_s24 }
 0x12e   : > { %s787_s26 = sshra.s32 %s2999_s25, 3  ;;  %s3739_s29 = sshll.u32 %s794_s28, 4  ;;  %s806_s29 = int_to_ptr.vmem [resolvable:$true] %s3739_s29 }
 0x12f   : > { %s3000_s27 = sshll.u32 %s787_s26, 5  ;;  %s795_s11 = scalar_lea.sflag [#allocation9], %s785_s22 }
 0x130   : > { %s791_s6 = scalar_lea.hbm %s3939_s5, %s3000_s27  ;;  %s3364_s9 = scalar_lea.hbm %s3939_s5, 4096 }
 0x131   : > { %s3745_s10 = sshll.u32 %s791_s6, 4  ;;  %s804_s10 = int_to_ptr.hbm [resolvable:$true] %s3745_s10 }
 0x132   : > { %s3358_s12 = sshra.s32 %s804_s10, 4  ;;  %s3359_s12 = int_to_ptr.hbm [resolvable:$true] %s3358_s12 }
 0x133   : > { %s3360_s13 = scalar_lea.hbm %s3359_s12, 512  ;;  %p3365_p11 = scmp.lt.s32.totalorder %s3359_s12, %s3939_s5 }
 0x134   : > { %p3361_p8 = scmp.ne.s32.totalorder %s3359_s12, %s3360_s13  ;;  %p3366_p12 = scmp.lt.s32.totalorder %s3364_s9, %s3360_s13 }
 0x136   : > { %p3362_p9 = pnand %p3361_p8, %p3135_p7  ;;  %p3367_p13 = por %p3366_p12, %p3365_p11 }
 0x138   : > { %p3363_p10 = pneg %p3362_p9 }
 0x13a   : > { %p3368_p0 = pnand %p3367_p13, %p3363_p10 }
 0x13c   : > { %3371 = shalt.err (!%p3368_p0)  }
 0x13d   : > { %s3372_s16 = sshra.s32 %s806_s29, 4  ;;  %s3449_s18 = smov [#allocation6]   ;;  %s3373_s16 = int_to_ptr.vmem [resolvable:$true] %s3372_s16 }
 0x13e   : > { %s3374_s0 = scalar_lea.vmem %s3373_s16, 512  ;;  %s3378_s2 = scalar_lea.vmem %s3449_s18, 1024 }
 0x13f   : > { %p3375_p1 = scmp.ne.s32.totalorder %s3373_s16, %s3374_s0  ;;  %p3379_p2 = scmp.lt.s32.totalorder %s3373_s16, [#allocation6] }
 0x140   : > { %p3380_p3 = scmp.lt.s32.totalorder %s3378_s2, %s3374_s0 }
 0x141   : > { %p3376_p4 = pnand %p3375_p1, %p3135_p7 }
 0x142   : > { %p3381_p8 = por %p3380_p3, %p3379_p2 }
 0x143   : > { %p3377_p5 = pneg %p3376_p4 }
 0x145   : > { %p3382_p9 = pnand %p3381_p8, %p3377_p5 }
 0x147   : > { %3385 = shalt.err (!%p3382_p9)  }
 0x148   : > { %3133 = dma.hbm_to_vmem [thread:$0]  (%p3135_p7), %s804_s10, 8192, %s806_s29, %s795_s11 }
 0x149   : > { %v2636_v12 = vld [vmem:[%s3729_s20 + $0x1c0] sm:$0xf]  ;;  %v3058_v14 = vld [vmem:[%s3729_s20 + $0x1c4] sm:$0xf]  ;;  %v2644_v17 = vld [vmem:[%s3729_s20 + $0x1c8] sm:$0xf] }
 0x14a   : > { %v3062_v13 = vld [vmem:[%s3729_s20 + $0x1dc] sm:$0xf0]  ;;  %v2638_v16 = vld [vmem:[%s3729_s20 + $0x1e0] sm:$0xf0]  ;;  %v3063_v18 = vld [vmem:[%s3729_s20 + $0x1e4] sm:$0xf0] }
 0x14b   : > { %v2637_v15 = vor.u32 %v3062_v13, %v2636_v12  ;;  %v2641_v19 = vor.u32 %v3058_v14, %v2638_v16  ;;  %v2645_v20 = vor.u32 %v3063_v18, %v2644_v17  ;;  %v3059_v52 = vld [vmem:[%s3729_s20 + $0x1cc] sm:$0xf]  ;;  %v2604_v22 = vld [vmem:[%s3729_s20 + $0x180] sm:$0xf]  ;;  %v3050_v25 = vld [vmem:[%s3729_s20 + $0x184] sm:$0xf] }
 0x14c   : > { %v2646_v21 = vld [vmem:[%s3729_s20 + $0x1e8] sm:$0xf0]  ;;  %v3054_v24 = vld [vmem:[%s3729_s20 + $0x19c] sm:$0xf0]  ;;  %v2606_v26 = vld [vmem:[%s3729_s20 + $0x1a0] sm:$0xf0] }
 0x14d   : > { %1207 = vmatpush.bf16.msra.mxu0 %v2637_v15  ;;  %v2649_v23 = vor.u32 %v3059_v52, %v2646_v21  ;;  %1220 = vmatpush.bf16.msra.mxu1 %v2641_v19  ;;  %v2605_v27 = vor.u32 %v3054_v24, %v2604_v22  ;;  %v2609_v28 = vor.u32 %v3050_v25, %v2606_v26  ;;  %v2612_v29 = vld [vmem:[%s3729_s20 + $0x188] sm:$0xf]  ;;  %v3051_v31 = vld [vmem:[%s3729_s20 + $0x18c] sm:$0xf]  ;;  %v2572_v34 = vld [vmem:[%s3729_s20 + $0x140] sm:$0xf] }
 0x14e   : > { %1233 = vmatpush.bf16.msra.mxu2 %v2645_v20  ;;  %v3055_v30 = vld [vmem:[%s3729_s20 + $0x1a4] sm:$0xf0]  ;;  %v2614_v33 = vld [vmem:[%s3729_s20 + $0x1a8] sm:$0xf0]  ;;  %v3046_v35 = vld [vmem:[%s3729_s20 + $0x15c] sm:$0xf0] }
 0x14f   : > { %1246 = vmatpush.bf16.msra.mxu3 %v2649_v23  ;;  %v2613_v32 = vor.u32 %v3055_v30, %v2612_v29  ;;  %v2617_v36 = vor.u32 %v3051_v31, %v2614_v33  ;;  %v3042_v37 = vld [vmem:[%s3729_s20 + $0x144] sm:$0xf]  ;;  %v2580_v39 = vld [vmem:[%s3729_s20 + $0x148] sm:$0xf]  ;;  %v2573_v40 = vor.u32 %v3046_v35, %v2572_v34  ;;  %v3043_v42 = vld [vmem:[%s3729_s20 + $0x14c] sm:$0xf] }
 0x150   : > { %v2574_v38 = vld [vmem:[%s3729_s20 + $0x160] sm:$0xf0]  ;;  %v3047_v41 = vld [vmem:[%s3729_s20 + $0x164] sm:$0xf0]  ;;  %v2582_v43 = vld [vmem:[%s3729_s20 + $0x168] sm:$0xf0] }
 0x151   : > { %1208 = vmatpush.bf16.msra.mxu0 %v2605_v27  ;;  %1221 = vmatpush.bf16.msra.mxu1 %v2609_v28  ;;  %v2577_v44 = vor.u32 %v3042_v37, %v2574_v38  ;;  %v2581_v45 = vor.u32 %v3047_v41, %v2580_v39  ;;  %v2540_v46 = vld [vmem:[%s3729_s20 + $0x100] sm:$0xf]  ;;  %v3034_v48 = vld [vmem:[%s3729_s20 + $0x104] sm:$0xf]  ;;  %v2585_v49 = vor.u32 %v3043_v42, %v2582_v43  ;;  %v2548_v51 = vld [vmem:[%s3729_s20 + $0x108] sm:$0xf] }
 0x152   : > { %1234 = vmatpush.bf16.msra.mxu2 %v2613_v32  ;;  %v3038_v47 = vld [vmem:[%s3729_s20 + $0x11c] sm:$0xf0]  ;;  %v2542_v50 = vld [vmem:[%s3729_s20 + $0x120] sm:$0xf0]  ;;  %v3039_v53 = vld [vmem:[%s3729_s20 + $0x124] sm:$0xf0] }
 0x153   : > { %1247 = vmatpush.bf16.msra.mxu3 %v2617_v36  ;;  %v3035_v54 = vld [vmem:[%s3729_s20 + $0x10c] sm:$0xf]  ;;  %v2541_v56 = vor.u32 %v3038_v47, %v2540_v46  ;;  %v2545_v57 = vor.u32 %v3034_v48, %v2542_v50  ;;  %v2549_v58 = vor.u32 %v3039_v53, %v2548_v51  ;;  %v2508_v59 = vld [vmem:[%s3729_s20 + $0xc0] sm:$0xf]  ;;  %v3026_v61 = vld [vmem:[%s3729_s20 + $0xc4] sm:$0xf] }
 0x154   : > { %v2550_v55 = vld [vmem:[%s3729_s20 + $0x128] sm:$0xf0]  ;;  %v3030_v60 = vld [vmem:[%s3729_s20 + $0xdc] sm:$0xf0]  ;;  %v2510_v63 = vld [vmem:[%s3729_s20 + $0xe0] sm:$0xf0] }
 0x155   : > { %1209 = vmatpush.bf16.msra.mxu0 %v2573_v40  ;;  %1222 = vmatpush.bf16.msra.mxu1 %v2577_v44  ;;  %v2553_v62 = vor.u32 %v3035_v54, %v2550_v55  ;;  %v2516_v1 = vld [vmem:[%s3729_s20 + $0xc8] sm:$0xf]  ;;  %v3027_v3 = vld [vmem:[%s3729_s20 + $0xcc] sm:$0xf]  ;;  %v2509_v5 = vor.u32 %v3030_v60, %v2508_v59  ;;  %v2513_v6 = vor.u32 %v3026_v61, %v2510_v63  ;;  %v2476_v8 = vld [vmem:[%s3729_s20 + $0x80] sm:$0xf] }
 0x156   : > { %1235 = vmatpush.bf16.msra.mxu2 %v2581_v45  ;;  %v3031_v2 = vld [vmem:[%s3729_s20 + $0xe4] sm:$0xf0]  ;;  %v2518_v4 = vld [vmem:[%s3729_s20 + $0xe8] sm:$0xf0]  ;;  %v3022_v9 = vld [vmem:[%s3729_s20 + $0x9c] sm:$0xf0] }
 0x157   : > { %1248 = vmatpush.bf16.msra.mxu3 %v2585_v49  ;;  %v2517_v7 = vor.u32 %v3031_v2, %v2516_v1  ;;  %v3018_v10 = vld [vmem:[%s3729_s20 + $0x84] sm:$0xf]  ;;  %v2521_v11 = vor.u32 %v3027_v3, %v2518_v4  ;;  %v2484_v13 = vld [vmem:[%s3729_s20 + $0x88] sm:$0xf]  ;;  %v3019_v15 = vld [vmem:[%s3729_s20 + $0x8c] sm:$0xf]  ;;  %v2477_v17 = vor.u32 %v3022_v9, %v2476_v8 }
 0x158   : > { %v2478_v12 = vld [vmem:[%s3729_s20 + $0xa0] sm:$0xf0]  ;;  %v3023_v14 = vld [vmem:[%s3729_s20 + $0xa4] sm:$0xf0]  ;;  %v2486_v16 = vld [vmem:[%s3729_s20 + $0xa8] sm:$0xf0] }
 0x159   : > { %1210 = vmatpush.bf16.msra.mxu0 %v2541_v56  ;;  %1223 = vmatpush.bf16.msra.mxu1 %v2545_v57  ;;  %s3814_s19 = sshra.s32 %s2998_s23, 7  ;;  %v2481_v18 = vor.u32 %v3018_v10, %v2478_v12  ;;  %v2485_v19 = vor.u32 %v3023_v14, %v2484_v13  ;;  %v2444_v20 = vld [vmem:[%s3729_s20 + $0x40] sm:$0xf]  ;;  %v3010_v21 = vld [vmem:[%s3729_s20 + $0x44] sm:$0xf]  ;;  %v2489_v22 = vor.u32 %v3019_v15, %v2486_v16 }
 0x15a   : > { %1236 = vmatpush.bf16.msra.mxu2 %v2549_v58  ;;  %v3014_v52 = vld [vmem:[%s3729_s20 + $0x5c] sm:$0xf0]  ;;  %v2446_v23 = vld [vmem:[%s3729_s20 + $0x60] sm:$0xf0]  ;;  %v2452_v24 = vld [vmem:[%s3729_s20 + $0x48] sm:$0xf] }
 0x15b   : > { %1249 = vmatpush.bf16.msra.mxu3 %v2553_v62  ;;  %v3015_v25 = vld [vmem:[%s3729_s20 + $0x64] sm:$0xf0]  ;;  %v3011_v26 = vld [vmem:[%s3729_s20 + $0x4c] sm:$0xf]  ;;  %s2409_s4 = sshll.u32 %s3814_s19, 2  ;;  %v2445_v28 = vor.u32 %v3014_v52, %v2444_v20  ;;  %v2449_v31 = vor.u32 %v3010_v21, %v2446_v23 }
 0x15c   : > { %v2454_v27 = vld [vmem:[%s3729_s20 + $0x68] sm:$0xf0]  ;;  %v2412_v29 = vld [vmem:[%s3729_s20] sm:$0xf]  ;;  %v2453_v32 = vor.u32 %v3015_v25, %v2452_v24  ;;  %v3002_v33 = vld [vmem:[%s3729_s20 + $0x4] sm:$0xf] }
 0x15d   : > { %1211 = vmatpush.bf16.msra.mxu0 %v2509_v5  ;;  %1224 = vmatpush.bf16.msra.mxu1 %v2513_v6  ;;  %v3006_v30 = vld [vmem:[%s3729_s20 + $0x1c] sm:$0xf0]  ;;  %v2414_v34 = vld [vmem:[%s3729_s20 + $0x20] sm:$0xf0]  ;;  %v2420_v35 = vld [vmem:[%s3729_s20 + $0x8] sm:$0xf]  ;;  %v2457_v36 = vor.u32 %v3011_v26, %v2454_v27 }
 0x15e   : > { %1237 = vmatpush.bf16.msra.mxu2 %v2517_v7  ;;  %v3007_v37 = vld [vmem:[%s3729_s20 + $0x24] sm:$0xf0]  ;;  %v3003_v38 = vld [vmem:[%s3729_s20 + $0xc] sm:$0xf]  ;;  %v2652_v40 = vld [vmem:[%s3729_s20 + $0x1d0] sm:$0xf]  ;;  %v2413_v43 = vor.u32 %v3006_v30, %v2412_v29  ;;  %v2417_v47 = vor.u32 %v3002_v33, %v2414_v34 }
 0x15f   : > { %1250 = vmatpush.bf16.msra.mxu3 %v2521_v11  ;;  %v2422_v39 = vld [vmem:[%s3729_s20 + $0x28] sm:$0xf0]  ;;  %v3064_v41 = vld [vmem:[%s3729_s20 + $0x1ec] sm:$0xf0]  ;;  %v3060_v42 = vld [vmem:[%s3729_s20 + $0x1d4] sm:$0xf]  ;;  %v2421_v48 = vor.u32 %v3007_v37, %v2420_v35 }
 0x160   : > { %v2654_v44 = vld [vmem:[%s3729_s20 + $0x1f0] sm:$0xf0]  ;;  %v2660_v45 = vld [vmem:[%s3729_s20 + $0x1d8] sm:$0xf]  ;;  %v3061_v49 = vld [vmem:[%s3729_s20 + $0x1dc] sm:$0xf]  ;;  %v2425_v51 = vor.u32 %v3003_v38, %v2422_v39  ;;  %v2653_v53 = vor.u32 %v3064_v41, %v2652_v40 }
 0x161   : > { %1212 = vmatpush.bf16.msra.mxu0 %v2477_v17  ;;  %1225 = vmatpush.bf16.msra.mxu1 %v2481_v18  ;;  %v3065_v46 = vld [vmem:[%s3729_s20 + $0x1f4] sm:$0xf0]  ;;  %v2662_v50 = vld [vmem:[%s3729_s20 + $0x1f8] sm:$0xf0]  ;;  %v2657_v54 = vor.u32 %v3060_v42, %v2654_v44  ;;  %v2620_v56 = vld [vmem:[%s3729_s20 + $0x190] sm:$0xf] }
 0x162   : > { %1238 = vmatpush.bf16.msra.mxu2 %v2485_v19  ;;  %v2661_v55 = vor.u32 %v3065_v46, %v2660_v45  ;;  %v3056_v57 = vld [vmem:[%s3729_s20 + $0x1ac] sm:$0xf0]  ;;  %v3052_v58 = vld [vmem:[%s3729_s20 + $0x194] sm:$0xf]  ;;  %v2665_v59 = vor.u32 %v3061_v49, %v2662_v50  ;;  %v2628_v61 = vld [vmem:[%s3729_s20 + $0x198] sm:$0xf] }
 0x163   : > { %1251 = vmatpush.bf16.msra.mxu3 %v2489_v22  ;;  %v2622_v60 = vld [vmem:[%s3729_s20 + $0x1b0] sm:$0xf0]  ;;  %v3057_v62 = vld [vmem:[%s3729_s20 + $0x1b4] sm:$0xf0]  ;;  %s821_s3 = scalar_lea.vmem [#allocation3], %s2409_s4  ;;  %v2621_v3 = vor.u32 %v3056_v57, %v2620_v56  ;;  %s3943_s4 = smov %s3732_s21 }
 0x164   : > { %v3849_v63 = vld [vmem:[%s821_s3] sm:$0xf]  ;;  %v3053_v1 = vld [vmem:[%s3729_s20 + $0x19c] sm:$0xf]  ;;  %v2625_v4 = vor.u32 %v3052_v58, %v2622_v60  ;;  %v2629_v5 = vor.u32 %v3057_v62, %v2628_v61  ;;  %v2588_v6 = vld [vmem:[%s3729_s20 + $0x150] sm:$0xf] }
 0x165   : > { %1213 = vmatpush.bf16.msra.mxu0 %v2445_v28  ;;  %1226 = vmatpush.bf16.msra.mxu1 %v2449_v31  ;;  %v2630_v2 = vld [vmem:[%s3729_s20 + $0x1b8] sm:$0xf0]  ;;  %v3048_v7 = vld [vmem:[%s3729_s20 + $0x16c] sm:$0xf0]  ;;  %v3044_v8 = vld [vmem:[%s3729_s20 + $0x154] sm:$0xf] }
 0x166   : > { %1239 = vmatpush.bf16.msra.mxu2 %v2453_v32  ;;  %v2633_v9 = vor.u32 %v3053_v1, %v2630_v2  ;;  %v2590_v10 = vld [vmem:[%s3729_s20 + $0x170] sm:$0xf0]  ;;  %v2596_v11 = vld [vmem:[%s3729_s20 + $0x158] sm:$0xf]  ;;  %v3045_v13 = vld [vmem:[%s3729_s20 + $0x15c] sm:$0xf]  ;;  %v2589_v15 = vor.u32 %v3048_v7, %v2588_v6 }
 0x167   : > { %1252 = vmatpush.bf16.msra.mxu3 %v2457_v36  ;;  %v3049_v12 = vld [vmem:[%s3729_s20 + $0x174] sm:$0xf0]  ;;  %v2598_v14 = vld [vmem:[%s3729_s20 + $0x178] sm:$0xf0]  ;;  %v2593_v16 = vor.u32 %v3044_v8, %v2590_v10  ;;  %v2556_v18 = vld [vmem:[%s3729_s20 + $0x110] sm:$0xf] }
 0x168   : > { %v2597_v17 = vor.u32 %v3049_v12, %v2596_v11  ;;  %v3040_v19 = vld [vmem:[%s3729_s20 + $0x12c] sm:$0xf0]  ;;  %v3036_v20 = vld [vmem:[%s3729_s20 + $0x114] sm:$0xf]  ;;  %v2601_v52 = vor.u32 %v3045_v13, %v2598_v14  ;;  %v2564_v22 = vld [vmem:[%s3729_s20 + $0x118] sm:$0xf] }
 0x169   : > { %1214 = vmatpush.bf16.msra.mxu0 %v2413_v43  ;;  %1227 = vmatpush.bf16.msra.mxu1 %v2417_v47  ;;  %v2558_v21 = vld [vmem:[%s3729_s20 + $0x130] sm:$0xf0]  ;;  %v3041_v23 = vld [vmem:[%s3729_s20 + $0x134] sm:$0xf0]  ;;  %v3037_v24 = vld [vmem:[%s3729_s20 + $0x11c] sm:$0xf]  ;;  %v2557_v26 = vor.u32 %v3040_v19, %v2556_v18 }
 0x16a   : > { %1240 = vmatpush.bf16.msra.mxu2 %v2421_v48  ;;  %v2566_v25 = vld [vmem:[%s3729_s20 + $0x138] sm:$0xf0]  ;;  %v2561_v27 = vor.u32 %v3036_v20, %v2558_v21  ;;  %v2565_v28 = vor.u32 %v3041_v23, %v2564_v22  ;;  %v2524_v29 = vld [vmem:[%s3729_s20 + $0xd0] sm:$0xf]  ;;  %v3028_v31 = vld [vmem:[%s3729_s20 + $0xd4] sm:$0xf] }
 0x16b   : > { %1253 = vmatpush.bf16.msra.mxu3 %v2425_v51  ;;  %v3032_v30 = vld [vmem:[%s3729_s20 + $0xec] sm:$0xf0]  ;;  %v2569_v32 = vor.u32 %v3037_v24, %v2566_v25  ;;  %v2526_v33 = vld [vmem:[%s3729_s20 + $0xf0] sm:$0xf0]  ;;  %v2532_v34 = vld [vmem:[%s3729_s20 + $0xd8] sm:$0xf] }
 0x16c   : > { %1215 = vmatmul.bf16.vlgmr.msra.gmra.mxu0 %v3849_v63  ;;  %1228 = vmatmul.bf16.vlgmr.msra.gmra.mxu1 %v3849_v63  ;;  %v3033_v35 = vld [vmem:[%s3729_s20 + $0xf4] sm:$0xf0]  ;;  %v3029_v36 = vld [vmem:[%s3729_s20 + $0xdc] sm:$0xf]  ;;  %v2525_v38 = vor.u32 %v3032_v30, %v2524_v29  ;;  %v2529_v39 = vor.u32 %v3028_v31, %v2526_v33  ;;  %v2492_v41 = vld [vmem:[%s3729_s20 + $0x90] sm:$0xf] }
 0x16d   : > { %1259 = vmatpush.bf16.msrb.mxu0 %v2653_v53  ;;  %1272 = vmatpush.bf16.msrb.mxu1 %v2657_v54  ;;  %v2534_v37 = vld [vmem:[%s3729_s20 + $0xf8] sm:$0xf0]  ;;  %v2533_v40 = vor.u32 %v3033_v35, %v2532_v34  ;;  %v3024_v42 = vld [vmem:[%s3729_s20 + $0xac] sm:$0xf0]  ;;  %v3020_v43 = vld [vmem:[%s3729_s20 + $0x94] sm:$0xf] }
 0x16e   : > { %1285 = vmatpush.bf16.msrb.mxu2 %v2661_v55  ;;  %1254 = vmatmul.bf16.vlgmr.msra.gmra.mxu3 %v3849_v63  ;;  %v2537_v44 = vor.u32 %v3029_v36, %v2534_v37  ;;  %v2494_v45 = vld [vmem:[%s3729_s20 + $0xb0] sm:$0xf0]  ;;  %v2500_v46 = vld [vmem:[%s3729_s20 + $0x98] sm:$0xf]  ;;  %v3021_v48 = vld [vmem:[%s3729_s20 + $0x9c] sm:$0xf]  ;;  %v2493_v50 = vor.u32 %v3024_v42, %v2492_v41 }
 0x16f   : > { %1298 = vmatpush.bf16.msrb.mxu3 %v2665_v59  ;;  %1241 = vmatmul.bf16.vlgmr.msra.gmra.mxu2 %v3849_v63  ;;  %v3025_v47 = vld [vmem:[%s3729_s20 + $0xb4] sm:$0xf0]  ;;  %v2502_v49 = vld [vmem:[%s3729_s20 + $0xb8] sm:$0xf0]  ;;  %v2497_v51 = vor.u32 %v3020_v43, %v2494_v45  ;;  %v2460_v54 = vld [vmem:[%s3729_s20 + $0x50] sm:$0xf] }
 0x170   : > { %v2501_v53 = vor.u32 %v3025_v47, %v2500_v46  ;;  %v3016_v55 = vld [vmem:[%s3729_s20 + $0x6c] sm:$0xf0]  ;;  %v3012_v56 = vld [vmem:[%s3729_s20 + $0x54] sm:$0xf]  ;;  %v2505_v57 = vor.u32 %v3021_v48, %v2502_v49  ;;  %v2468_v59 = vld [vmem:[%s3729_s20 + $0x58] sm:$0xf] }
 0x171   : > { %1260 = vmatpush.bf16.msrb.mxu0 %v2621_v3  ;;  %1273 = vmatpush.bf16.msrb.mxu1 %v2625_v4  ;;  %v2462_v58 = vld [vmem:[%s3729_s20 + $0x70] sm:$0xf0]  ;;  %v3017_v60 = vld [vmem:[%s3729_s20 + $0x74] sm:$0xf0]  ;;  %v3013_v61 = vld [vmem:[%s3729_s20 + $0x5c] sm:$0xf]  ;;  %v2461_v1 = vor.u32 %v3016_v55, %v2460_v54 }
 0x172   : > { %1286 = vmatpush.bf16.msrb.mxu2 %v2629_v5  ;;  %v2470_v62 = vld [vmem:[%s3729_s20 + $0x78] sm:$0xf0]  ;;  %v2465_v2 = vor.u32 %v3012_v56, %v2462_v58  ;;  %v2469_v3 = vor.u32 %v3017_v60, %v2468_v59  ;;  %v2428_v4 = vld [vmem:[%s3729_s20 + $0x10] sm:$0xf]  ;;  %v3004_v6 = vld [vmem:[%s3729_s20 + $0x14] sm:$0xf] }
 0x173   : > { %1299 = vmatpush.bf16.msrb.mxu3 %v2633_v9  ;;  %v3008_v5 = vld [vmem:[%s3729_s20 + $0x2c] sm:$0xf0]  ;;  %v2473_v7 = vor.u32 %v3013_v61, %v2470_v62  ;;  %v2430_v8 = vld [vmem:[%s3729_s20 + $0x30] sm:$0xf0]  ;;  %v2436_v9 = vld [vmem:[%s3729_s20 + $0x18] sm:$0xf] }
 0x174   : > { %v3009_v10 = vld [vmem:[%s3729_s20 + $0x34] sm:$0xf0]  ;;  %v3005_v11 = vld [vmem:[%s3729_s20 + $0x1c] sm:$0xf]  ;;  %v2429_v13 = vor.u32 %v3008_v5, %v2428_v4  ;;  %v2433_v14 = vor.u32 %v3004_v6, %v2430_v8  ;;  %v810_v18 = vld [vmem:[#allocation2] sm:$0xff] }
 0x175   : > { %1261 = vmatpush.bf16.msrb.mxu0 %v2589_v15  ;;  %1274 = vmatpush.bf16.msrb.mxu1 %v2593_v16  ;;  %v2438_v12 = vld [vmem:[%s3729_s20 + $0x38] sm:$0xf0]  ;;  %v2437_v15 = vor.u32 %v3009_v10, %v2436_v9  ;;  %v812_v23 = vld [vmem:[#allocation2 + $0x10] sm:$0xff]  ;;  %v813_v31 = vld [vmem:[#allocation2 + $0x8] sm:$0xff] }
 0x176   : > { %1287 = vmatpush.bf16.msrb.mxu2 %v2597_v17  ;;  %v2441_v16 = vor.u32 %v3005_v11, %v2438_v12  ;;  %v809_v17 = vld [vmem:[#allocation2 + $0x30] sm:$0xff]  ;;  %v811_v22 = vld [vmem:[#allocation2 + $0x18] sm:$0xff]  ;;  %v815_v37 = vld [vmem:[#allocation2 + $0x28] sm:$0xff] }
 0x177   : > { %1300 = vmatpush.bf16.msrb.mxu3 %v2601_v52  ;;  %v1335_v54 = vld [vmem:[#allocation16] sm:$0xff] (%p2402_p6) }
 0x178   :  { %v1338_v58 = vperm.slane (%p2402_p6), %v1335_v54, 1  ;;  %v1339_v59 = vperm.slane (%p2402_p6), %v1335_v54, 2  ;;  %v1340_v60 = vperm.slane (%p2402_p6), %v1335_v54, 3  ;;  %v1341_v61 = vperm.slane (%p2402_p6), %v1335_v54, 4 }
 0x179   : > { %1262 = vmatpush.bf16.msrb.mxu0 %v2557_v26  ;;  %1275 = vmatpush.bf16.msrb.mxu1 %v2561_v27  ;;  %v1342_v62 = vperm.slane (%p2402_p6), %v1335_v54, 5 }
 0x17a   : > { %1288 = vmatpush.bf16.msrb.mxu2 %v2565_v28 }
 0x17b   : > { %1301 = vmatpush.bf16.msrb.mxu3 %v2569_v32  ;;  %v814_v32 = vld [vmem:[#allocation2 + $0x20] sm:$0xff] }
 0x17d   : > { %1263 = vmatpush.bf16.msrb.mxu0 %v2525_v38  ;;  %1276 = vmatpush.bf16.msrb.mxu1 %v2529_v39  ;;  %v816_v38 = vld [vmem:[#allocation2 + $0x38] sm:$0xff] }
 0x17e   : > { %1289 = vmatpush.bf16.msrb.mxu2 %v2533_v40 }
 0x17f   : > { %1302 = vmatpush.bf16.msrb.mxu3 %v2537_v44 }
 0x181   : > { %1264 = vmatpush.bf16.msrb.mxu0 %v2493_v50  ;;  %1277 = vmatpush.bf16.msrb.mxu1 %v2497_v51 }
 0x182   : > { %1290 = vmatpush.bf16.msrb.mxu2 %v2501_v53 }
 0x183   : > { %1303 = vmatpush.bf16.msrb.mxu3 %v2505_v57  ;;  %v1337_v57 = vperm.slane (%p2402_p6), %v1335_v54, 0 }
 0x185   : > { %1265 = vmatpush.bf16.msrb.mxu0 %v2461_v1  ;;  %1278 = vmatpush.bf16.msrb.mxu1 %v2465_v2  ;;  %v1343_v1 = vperm.slane (%p2402_p6), %v1335_v54, 6  ;;  %v1344_v2 = vperm.slane (%p2402_p6), %v1335_v54, 7 }
 0x186   : > { %1291 = vmatpush.bf16.msrb.mxu2 %v2469_v3 }
 0x187   : > { %1304 = vmatpush.bf16.msrb.mxu3 %v2473_v7 }
 0x189   : > { %1266 = vmatpush.bf16.msrb.mxu0 %v2429_v13  ;;  %1279 = vmatpush.bf16.msrb.mxu1 %v2433_v14 }
 0x18a   : > { %1292 = vmatpush.bf16.msrb.mxu2 %v2437_v15 }
 0x18b   : > { %1305 = vmatpush.bf16.msrb.mxu3 %v2441_v16 }
 0x18c   : > { %1267 = vmatmul.bf16.vlgmr.msrb.gmra.mxu0 %v3849_v63  ;;  %1280 = vmatmul.bf16.vlgmr.msrb.gmra.mxu1 %v3849_v63 }
 0x18d   : > { %1293 = vmatmul.bf16.vlgmr.msrb.gmra.mxu2 %v3849_v63 }
 0x18e   : > { %1306 = vmatmul.bf16.vlgmr.msrb.gmra.mxu3 %v3849_v63 }
 0x1e9   : > { %v1216_v19 = vpop.f32.mrf.mxu0  ;;  %v1229_v52 = vpop.f32.mrf.mxu1 }
 0x1ea   : > { %v1311_v20 = vadd.f32 %v1216_v19, %v809_v17  ;;  %v1312_v21 = vadd.f32 %v1229_v52, %v810_v18 }
 0x1ec   : > { %1319 = vst [vmem:[#allocation2 + $0x30] sm:$0xff] %v1311_v20 }
 0x1ed   : > { %1320 = vst [vmem:[#allocation2] sm:$0xff] %v1312_v21 }
 0x1f1   : > { %v1255_v26 = vpop.f32.mrf.mxu3  ;;  %v1218_v28 = vpop.f32.mrf.mxu0 }
 0x1f2   : > { %v1242_v24 = vpop.f32.mrf.mxu2  ;;  %v1314_v27 = vadd.f32 %v1255_v26, %v812_v23  ;;  %v1231_v29 = vpop.f32.mrf.mxu1 }
 0x1f3   : > { %v1313_v25 = vadd.f32 %v1242_v24, %v811_v22  ;;  %v1327_v47 = vld [vmem:[#allocation2 + $0x30] sm:$0xff] (%p2402_p6) }
 0x1f4   : > { %1322 = vst [vmem:[#allocation2 + $0x10] sm:$0xff] %v1314_v27  ;;  %v1328_v48 = vld [vmem:[#allocation2] sm:$0xff] (%p2402_p6)  ;;  %v1353_v3 = vadd.f32 (%p2402_p6), %v1337_v57, %v1327_v47 }
 0x1f5   : > { %1321 = vst [vmem:[#allocation2 + $0x18] sm:$0xff] %v1313_v25  ;;  %v1354_v4 = vadd.f32 (%p2402_p6), %v1338_v58, %v1328_v48 }
 0x1f6   :  { %1377 = vst [vmem:[#allocation2 + $0x30] sm:$0xff] (%p2402_p6), %v3445_v0  ;;  %v1361_v10 = vmax.f32 (%p2402_p6), %v1353_v3, 0.0 }
 0x1f7   :  { %v1362_v11 = vmax.f32 (%p2402_p6), %v1354_v4, 0.0 }
 0x1f9   : > { %v1257_v63 = vpop.f32.mrf.mxu3  ;;  %v3915_v18 = vpack.c.bf16 (%p2402_p6), %v1362_v11, %v1361_v10 }
 0x1fa   : > { %v1244_v30 = vpop.f32.mrf.mxu2 }
 0x1fb   :  { %v1330_v50 = vld [vmem:[#allocation2 + $0x10] sm:$0xff] (%p2402_p6) }
 0x1fc   :  { %v1329_v49 = vld [vmem:[#allocation2 + $0x18] sm:$0xff] (%p2402_p6)  ;;  %v1356_v6 = vadd.f32 (%p2402_p6), %v1340_v60, %v1330_v50 }
 0x1fd   :  { %v1355_v5 = vadd.f32 (%p2402_p6), %v1339_v59, %v1329_v49 }
 0x1fe   :  { %v1364_v13 = vmax.f32 (%p2402_p6), %v1356_v6, 0.0 }
 0x1ff   :  { %v1363_v12 = vmax.f32 (%p2402_p6), %v1355_v5, 0.0 }
 0x201   :  { %v3917_v19 = vpack.c.bf16 (%p2402_p6), %v1364_v13, %v1363_v12 }
 0x209   : > { %v1268_v33 = vpop.f32.mrf.mxu0  ;;  %v1281_v35 = vpop.f32.mrf.mxu1 }
 0x20a   : > { %v1315_v34 = vadd.f32 %v1268_v33, %v813_v31  ;;  %v1316_v36 = vadd.f32 %v1281_v35, %v814_v32 }
 0x20c   : > { %1323 = vst [vmem:[#allocation2 + $0x8] sm:$0xff] %v1315_v34 }
 0x20d   : > { %1324 = vst [vmem:[#allocation2 + $0x20] sm:$0xff] %v1316_v36 }
 0x210   : > { %v1294_v39 = vpop.f32.mrf.mxu2 }
 0x211   : > { %v1317_v40 = vadd.f32 %v1294_v39, %v815_v37  ;;  %v1307_v41 = vpop.f32.mrf.mxu3  ;;  %v1270_v42 = vpop.f32.mrf.mxu0 }
 0x212   : > { %v1318_v43 = vadd.f32 %v1307_v41, %v816_v38  ;;  %v1283_v44 = vpop.f32.mrf.mxu1 }
 0x213   : > { %1325 = vst [vmem:[#allocation2 + $0x28] sm:$0xff] %v1317_v40  ;;  %v1331_v51 = vld [vmem:[#allocation2 + $0x8] sm:$0xff] (%p2402_p6) }
 0x214   : > { %1326 = vst [vmem:[#allocation2 + $0x38] sm:$0xff] %v1318_v43  ;;  %v1332_v53 = vld [vmem:[#allocation2 + $0x20] sm:$0xff] (%p2402_p6)  ;;  %v1357_v7 = vadd.f32 (%p2402_p6), %v1341_v61, %v1331_v51 }
 0x215   :  { %758 = sbr.rel (!%p2402_p6) target bundleno = 287 (0x11f), region = 120  ;;  %v1358_v8 = vadd.f32 (%p2402_p6), %v1342_v62, %v1332_v53 }
 0x216   :  { %v1365_v14 = vmax.f32 (%p2402_p6), %v1357_v7, 0.0 }
 0x217   :  { %v1366_v15 = vmax.f32 (%p2402_p6), %v1358_v8, 0.0 }
 0x218   : > { %v1296_v45 = vpop.f32.mrf.mxu2 }
 0x219   : > { %v1309_v46 = vpop.f32.mrf.mxu3  ;;  %v3919_v20 = vpack.c.bf16 (%p2402_p6), %v1366_v15, %v1365_v14 }
 0x21a   :  { %v1333_v55 = vld [vmem:[#allocation2 + $0x28] sm:$0xff] }
 0x21b   :  { %v1334_v56 = vld [vmem:[#allocation2 + $0x38] sm:$0xff]  ;;  %v1359_v0 = vadd.f32 %v1343_v1, %v1333_v55 }
 0x21c   :  { %v1360_v9 = vadd.f32 %v1344_v2, %v1334_v56 }
 0x21d   :  { %v1367_v16 = vmax.f32 %v1359_v0, 0.0 }
 0x21e   :  { %v1368_v17 = vmax.f32 %v1360_v9, 0.0 }
 0x220   :  { %v3921_v52 = vpack.c.bf16 %v1368_v17, %v1367_v16 }
 0x221   :  { %3428 = dma.done.wait [#allocation10], 8192 }
 0x222   :  { %3429 = vsyncadd [#allocation10], 4294959104  ;;  %v3073_v21 = vld [vmem:[#allocation7 + $0x38] sm:$0xff]  ;;  %v3072_v25 = vld [vmem:[#allocation7 + $0x30] sm:$0xff]  ;;  %v1521_v50 = vunpack.c.l.b16 %v3917_v19  ;;  %v1519_v51 = vunpack.c.l.b16 %v3915_v18  ;;  %v1522_v55 = vunpack.c.h.b16 %v3917_v19  ;;  %v1520_v56 = vunpack.c.h.b16 %v3915_v18  ;;  %s3450_s5 = smov [#allocation19]   ;;  %s2047_s23 = sshll.u32 %s3941_s7, 4  ;;  %s2048_s23 = int_to_ptr.hbm [resolvable:$true] %s2047_s23 }
 0x223   :  { %v3081_v22 = vld [vmem:[#allocation7 + $0x78] sm:$0xff]  ;;  %1927 = vmatpush.bf16.msra.mxu0 %v3073_v21  ;;  %v3080_v26 = vld [vmem:[#allocation7 + $0x70] sm:$0xff]  ;;  %v3071_v29 = vld [vmem:[#allocation7 + $0x28] sm:$0xff]  ;;  %s2045_s20 = sshll.u32 %s3450_s5, 4  ;;  %s2046_s20 = int_to_ptr.vmem [resolvable:$true] %s2045_s20 }
 0x224   :  { %v3089_v23 = vld [vmem:[#allocation7 + $0xb8] sm:$0xff]  ;;  %1940 = vmatpush.bf16.msra.mxu1 %v3081_v22  ;;  %v3088_v27 = vld [vmem:[#allocation7 + $0xb0] sm:$0xff]  ;;  %v3079_v30 = vld [vmem:[#allocation7 + $0x68] sm:$0xff]  ;;  %v1529_v61 = vpack.c.b16 %v1521_v50, %v1521_v50  ;;  %v1527_v62 = vpack.c.b16 %v1519_v51, %v1519_v51  ;;  %v1530_v1 = vpack.c.b16 %v1522_v55, %v1522_v55  ;;  %v1528_v2 = vpack.c.b16 %v1520_v56, %v1520_v56 }
 0x225   :  { %v3097_v24 = vld [vmem:[#allocation7 + $0xf8] sm:$0xff]  ;;  %1953 = vmatpush.bf16.msra.mxu2 %v3089_v23  ;;  %v3096_v28 = vld [vmem:[#allocation7 + $0xf0] sm:$0xff]  ;;  %v3087_v63 = vld [vmem:[#allocation7 + $0xa8] sm:$0xff] }
 0x226   :  { %1966 = vmatpush.bf16.msra.mxu3 %v3097_v24  ;;  %v3095_v31 = vld [vmem:[#allocation7 + $0xe8] sm:$0xff]  ;;  %v3070_v32 = vld [vmem:[#allocation7 + $0x20] sm:$0xff]  ;;  %v3069_v36 = vld [vmem:[#allocation7 + $0x18] sm:$0xff] }
 0x227   :  { %1928 = vmatpush.bf16.msra.mxu0 %v3072_v25  ;;  %v3078_v33 = vld [vmem:[#allocation7 + $0x60] sm:$0xff]  ;;  %v3077_v37 = vld [vmem:[#allocation7 + $0x58] sm:$0xff]  ;;  %v3068_v40 = vld [vmem:[#allocation7 + $0x10] sm:$0xff] }
 0x228   :  { %1941 = vmatpush.bf16.msra.mxu1 %v3080_v26  ;;  %v3086_v34 = vld [vmem:[#allocation7 + $0xa0] sm:$0xff]  ;;  %v3085_v38 = vld [vmem:[#allocation7 + $0x98] sm:$0xff]  ;;  %v3076_v41 = vld [vmem:[#allocation7 + $0x50] sm:$0xff] }
 0x229   :  { %1954 = vmatpush.bf16.msra.mxu2 %v3088_v27  ;;  %v3094_v35 = vld [vmem:[#allocation7 + $0xe0] sm:$0xff]  ;;  %v3093_v39 = vld [vmem:[#allocation7 + $0xd8] sm:$0xff]  ;;  %v3084_v42 = vld [vmem:[#allocation7 + $0x90] sm:$0xff]  ;;  %v1523_v27 = vunpack.c.l.b16 %v3919_v20 }
 0x22a   :  { %1967 = vmatpush.bf16.msra.mxu3 %v3096_v28  ;;  %v3092_v43 = vld [vmem:[#allocation7 + $0xd0] sm:$0xff]  ;;  %v3067_v44 = vld [vmem:[#allocation7 + $0x8] sm:$0xff]  ;;  %v3066_v48 = vld [vmem:[#allocation7] sm:$0xff]  ;;  %v1524_v28 = vunpack.c.h.b16 %v3919_v20 }
 0x22b   :  { %1929 = vmatpush.bf16.msra.mxu0 %v3071_v29  ;;  %v3075_v45 = vld [vmem:[#allocation7 + $0x48] sm:$0xff]  ;;  %v3074_v49 = vld [vmem:[#allocation7 + $0x40] sm:$0xff]  ;;  %v3105_v57 = vld [vmem:[#allocation7 + $0x138] sm:$0xff] }
 0x22c   :  { %1942 = vmatpush.bf16.msra.mxu1 %v3079_v30  ;;  %v3083_v46 = vld [vmem:[#allocation7 + $0x88] sm:$0xff]  ;;  %v3082_v53 = vld [vmem:[#allocation7 + $0x80] sm:$0xff]  ;;  %v3113_v58 = vld [vmem:[#allocation7 + $0x178] sm:$0xff] }
 0x22d   :  { %1955 = vmatpush.bf16.msra.mxu2 %v3087_v63  ;;  %v3091_v47 = vld [vmem:[#allocation7 + $0xc8] sm:$0xff]  ;;  %v3090_v54 = vld [vmem:[#allocation7 + $0xc0] sm:$0xff]  ;;  %v3121_v59 = vld [vmem:[#allocation7 + $0x1b8] sm:$0xff]  ;;  %v1525_v63 = vunpack.c.l.b16 %v3921_v52 }
 0x22e   :  { %1968 = vmatpush.bf16.msra.mxu3 %v3095_v31  ;;  %v3129_v60 = vld [vmem:[#allocation7 + $0x1f8] sm:$0xff]  ;;  %v3104_v3 = vld [vmem:[#allocation7 + $0x130] sm:$0xff]  ;;  %v3103_v7 = vld [vmem:[#allocation7 + $0x128] sm:$0xff]  ;;  %v1526_v31 = vunpack.c.h.b16 %v3921_v52 }
 0x22f   :  { %1930 = vmatpush.bf16.msra.mxu0 %v3070_v32  ;;  %v3112_v4 = vld [vmem:[#allocation7 + $0x170] sm:$0xff]  ;;  %v3111_v8 = vld [vmem:[#allocation7 + $0x168] sm:$0xff]  ;;  %v3102_v10 = vld [vmem:[#allocation7 + $0x120] sm:$0xff] }
 0x230   :  { %1943 = vmatpush.bf16.msra.mxu1 %v3078_v33  ;;  %v3120_v5 = vld [vmem:[#allocation7 + $0x1b0] sm:$0xff]  ;;  %v3119_v0 = vld [vmem:[#allocation7 + $0x1a8] sm:$0xff]  ;;  %v3110_v11 = vld [vmem:[#allocation7 + $0x160] sm:$0xff] }
 0x231   :  { %1956 = vmatpush.bf16.msra.mxu2 %v3086_v34  ;;  %v3128_v6 = vld [vmem:[#allocation7 + $0x1f0] sm:$0xff]  ;;  %v3127_v9 = vld [vmem:[#allocation7 + $0x1e8] sm:$0xff]  ;;  %v3118_v12 = vld [vmem:[#allocation7 + $0x1a0] sm:$0xff]  ;;  %v1531_v34 = vpack.c.b16 %v1523_v27, %v1523_v27 }
 0x232   :  { %1969 = vmatpush.bf16.msra.mxu3 %v3094_v35  ;;  %v3126_v13 = vld [vmem:[#allocation7 + $0x1e0] sm:$0xff]  ;;  %v3101_v14 = vld [vmem:[#allocation7 + $0x118] sm:$0xff]  ;;  %v3100_v18 = vld [vmem:[#allocation7 + $0x110] sm:$0xff]  ;;  %v1532_v35 = vpack.c.b16 %v1524_v28, %v1524_v28 }
 0x233   :  { %1931 = vmatpush.bf16.msra.mxu0 %v3069_v36  ;;  %v3109_v15 = vld [vmem:[#allocation7 + $0x158] sm:$0xff]  ;;  %v3108_v19 = vld [vmem:[#allocation7 + $0x150] sm:$0xff]  ;;  %v3099_v23 = vld [vmem:[#allocation7 + $0x108] sm:$0xff]  ;;  %v1533_v36 = vpack.c.b16 %v1525_v63, %v1525_v63 }
 0x234   :  { %1944 = vmatpush.bf16.msra.mxu1 %v3077_v37  ;;  %v3117_v16 = vld [vmem:[#allocation7 + $0x198] sm:$0xff]  ;;  %v3116_v21 = vld [vmem:[#allocation7 + $0x190] sm:$0xff]  ;;  %v3107_v24 = vld [vmem:[#allocation7 + $0x148] sm:$0xff]  ;;  %v1534_v37 = vpack.c.b16 %v1526_v31, %v1526_v31 }
 0x235   :  { %1957 = vmatpush.bf16.msra.mxu2 %v3085_v38  ;;  %v3125_v17 = vld [vmem:[#allocation7 + $0x1d8] sm:$0xff]  ;;  %v3124_v22 = vld [vmem:[#allocation7 + $0x1d0] sm:$0xff]  ;;  %v3115_v25 = vld [vmem:[#allocation7 + $0x188] sm:$0xff] }
 0x236   :  { %1970 = vmatpush.bf16.msra.mxu3 %v3093_v39  ;;  %v3123_v26 = vld [vmem:[#allocation7 + $0x1c8] sm:$0xff]  ;;  %v3098_v29 = vld [vmem:[#allocation7 + $0x100] sm:$0xff] }
 0x237   :  { %1932 = vmatpush.bf16.msra.mxu0 %v3068_v40  ;;  %v3106_v30 = vld [vmem:[#allocation7 + $0x140] sm:$0xff] }
 0x238   :  { %1945 = vmatpush.bf16.msra.mxu1 %v3076_v41  ;;  %v3114_v32 = vld [vmem:[#allocation7 + $0x180] sm:$0xff] }
 0x239   :  { %1958 = vmatpush.bf16.msra.mxu2 %v3084_v42  ;;  %v3122_v33 = vld [vmem:[#allocation7 + $0x1c0] sm:$0xff] }
 0x23a   :  { %1971 = vmatpush.bf16.msra.mxu3 %v3092_v43 }
 0x23b   :  { %1933 = vmatpush.bf16.msra.mxu0 %v3067_v44 }
 0x23c   :  { %1946 = vmatpush.bf16.msra.mxu1 %v3075_v45 }
 0x23d   :  { %1959 = vmatpush.bf16.msra.mxu2 %v3083_v46 }
 0x23e   :  { %1972 = vmatpush.bf16.msra.mxu3 %v3091_v47 }
 0x23f   :  { %1934 = vmatpush.bf16.msra.mxu0 %v3066_v48 }
 0x240   :  { %1947 = vmatpush.bf16.msra.mxu1 %v3074_v49 }
 0x241   :  { %1960 = vmatpush.bf16.msra.mxu2 %v3082_v53 }
 0x242   :  { %1973 = vmatpush.bf16.msra.mxu3 %v3090_v54  ;;  %1935 = vmatmul.bf16.vlgmr.msra.gmra.mxu0 %v1527_v62 }
 0x243   :  { %1979 = vmatpush.bf16.msrb.mxu0 %v3105_v57  ;;  %1948 = vmatmul.bf16.vlgmr.msra.gmra.mxu1 %v1528_v2  ;;  %v1382_v57 = vld [vmem:[#allocation2 + $0x30] sm:$0xff] }
 0x244   :  { %1992 = vmatpush.bf16.msrb.mxu1 %v3113_v58  ;;  %1961 = vmatmul.bf16.vlgmr.msra.gmra.mxu2 %v1529_v61 }
 0x245   :  { %2005 = vmatpush.bf16.msrb.mxu2 %v3121_v59  ;;  %1974 = vmatmul.bf16.vlgmr.msra.gmra.mxu3 %v1530_v1  ;;  %v3161_v59 = vld [vmem:[#allocation17] ss:$0 sm:$0xff] }
 0x246   :  { %2018 = vmatpush.bf16.msrb.mxu3 %v3129_v60 }
 0x247   :  { %1980 = vmatpush.bf16.msrb.mxu0 %v3104_v3 }
 0x248   :  { %1993 = vmatpush.bf16.msrb.mxu1 %v3112_v4 }
 0x249   :  { %2006 = vmatpush.bf16.msrb.mxu2 %v3120_v5 }
 0x24a   :  { %2019 = vmatpush.bf16.msrb.mxu3 %v3128_v6 }
 0x24b   :  { %1981 = vmatpush.bf16.msrb.mxu0 %v3103_v7 }
 0x24c   :  { %1994 = vmatpush.bf16.msrb.mxu1 %v3111_v8 }
 0x24d   :  { %2007 = vmatpush.bf16.msrb.mxu2 %v3119_v0 }
 0x24e   :  { %2020 = vmatpush.bf16.msrb.mxu3 %v3127_v9 }
 0x24f   :  { %1982 = vmatpush.bf16.msrb.mxu0 %v3102_v10 }
 0x250   :  { %1995 = vmatpush.bf16.msrb.mxu1 %v3110_v11 }
 0x251   :  { %2008 = vmatpush.bf16.msrb.mxu2 %v3118_v12 }
 0x252   :  { %2021 = vmatpush.bf16.msrb.mxu3 %v3126_v13 }
 0x253   :  { %1983 = vmatpush.bf16.msrb.mxu0 %v3101_v14 }
 0x254   :  { %1996 = vmatpush.bf16.msrb.mxu1 %v3109_v15 }
 0x255   :  { %2009 = vmatpush.bf16.msrb.mxu2 %v3117_v16 }
 0x256   :  { %2022 = vmatpush.bf16.msrb.mxu3 %v3125_v17 }
 0x257   :  { %1984 = vmatpush.bf16.msrb.mxu0 %v3100_v18 }
 0x258   :  { %1997 = vmatpush.bf16.msrb.mxu1 %v3108_v19 }
 0x259   :  { %2010 = vmatpush.bf16.msrb.mxu2 %v3116_v21 }
 0x25a   :  { %2023 = vmatpush.bf16.msrb.mxu3 %v3124_v22 }
 0x25b   :  { %1985 = vmatpush.bf16.msrb.mxu0 %v3099_v23 }
 0x25c   :  { %1998 = vmatpush.bf16.msrb.mxu1 %v3107_v24 }
 0x25d   :  { %2011 = vmatpush.bf16.msrb.mxu2 %v3115_v25 }
 0x25e   :  { %2024 = vmatpush.bf16.msrb.mxu3 %v3123_v26 }
 0x25f   :  { %1986 = vmatpush.bf16.msrb.mxu0 %v3098_v29 }
 0x260   :  { %1999 = vmatpush.bf16.msrb.mxu1 %v3106_v30 }
 0x261   :  { %2012 = vmatpush.bf16.msrb.mxu2 %v3114_v32 }
 0x262   :  { %2025 = vmatpush.bf16.msrb.mxu3 %v3122_v33  ;;  %1987 = vmatmul.bf16.vlgmr.msrb.gmra.mxu0 %v1531_v34 }
 0x263   :  { %2000 = vmatmul.bf16.vlgmr.msrb.gmra.mxu1 %v1532_v35 }
 0x264   :  { %2013 = vmatmul.bf16.vlgmr.msrb.gmra.mxu2 %v1533_v36 }
 0x265   :  { %2026 = vmatmul.bf16.vlgmr.msrb.gmra.mxu3 %v1534_v37 }
 0x2bf   :  { %v1936_v20 = vpop.f32.mrf.mxu0 }
 0x2c0   :  { %v1949_v38 = vpop.f32.mrf.mxu1 }
 0x2c1   :  { %v1950_v44 = vadd.f32 %v1949_v38, %v1936_v20 }
 0x2c7   :  { %v1962_v39 = vpop.f32.mrf.mxu2  ;;  %v1938_v40 = vpop.f32.mrf.mxu0 }
 0x2c8   :  { %v1975_v52 = vpop.f32.mrf.mxu3  ;;  %v1951_v41 = vpop.f32.mrf.mxu1  ;;  %v1963_v45 = vadd.f32 %v1962_v39, %v1950_v44 }
 0x2ca   :  { %v1976_v46 = vadd.f32 %v1975_v52, %v1963_v45 }
 0x2cf   :  { %v1964_v42 = vpop.f32.mrf.mxu2 }
 0x2d0   :  { %v1977_v43 = vpop.f32.mrf.mxu3 }
 0x2df   :  { %v1988_v47 = vpop.f32.mrf.mxu0 }
 0x2e0   :  { %v2001_v48 = vpop.f32.mrf.mxu1  ;;  %v1989_v49 = vadd.f32 %v1988_v47, %v1976_v46 }
 0x2e2   :  { %v2002_v50 = vadd.f32 %v2001_v48, %v1989_v49 }
 0x2e7   :  { %v2014_v51 = vpop.f32.mrf.mxu2  ;;  %v1990_v55 = vpop.f32.mrf.mxu0 }
 0x2e8   :  { %v2027_v53 = vpop.f32.mrf.mxu3  ;;  %v2015_v54 = vadd.f32 %v2014_v51, %v2002_v50  ;;  %v2003_v56 = vpop.f32.mrf.mxu1 }
 0x2ea   :  { %v2028_v58 = vadd.f32 %v2027_v53, %v2015_v54 }
 0x2ec   :  { %v2031_v60 = vadd.f32 %v2028_v58, %v1382_v57 }
 0x2ee   :  { %2032 = vst [vmem:[#allocation2 + $0x30] sm:$0xff] %v2031_v60  ;;  %v2038_v61 = vadd.f32 %v3161_v59, %v2031_v60 }
 0x2ef   :  { %v2016_v62 = vpop.f32.mrf.mxu2 }
 0x2f0   :  { %v2029_v1 = vpop.f32.mrf.mxu3  ;;  %2039 = vst [vmem:[#allocation19] sm:$0xff] %v2038_v61 }
 0x2f1   :  { %2050 = dma.vmem_to_hbm [thread:$0]  %s2046_s20, 128, %s2048_s23, [#allocation13]  }
 0x2f2   :  { %3430 = dma.done.wait [#allocation13], 128  }
 0x2f3   :  { %3431 = vsyncadd [#allocation13], 4294967168 }
 0x2f4   :  { %2055 = vsyncpa [#allocation12], 1 }
 0x2f5   :  { %2056 = vsyncpa [#allocation15], 1 }
 0x2f6   :  { %2057 = vsyncpa [#allocation18], 1 }
 0x2f7   :  { %2058 = vsyncpa [#allocation13], 1 }
 0x2f8   :  { %2059 = vsyncmov [#allocation8] }
 0x2fb   :  { %s2060_s24 = vpop.sfrf %2059 }
 0x2fc   :  { %p2922_p6 = scmp.ne.s32.totalorder %s2060_s24, 0 }
 0x2fe   :  { %2064 = shalt.err (%p2922_p6)  }
 0x2ff   :  { %2066 = vsyncmov [#allocation8 + $0x1] }
 0x302   :  { %s2067_s7 = vpop.sfrf %2066 }
 0x303   :  { %p2923_p7 = scmp.ne.s32.totalorder %s2067_s7, 0 }
 0x305   :  { %2071 = shalt.err (%p2923_p7)  }
 0x306   :  { %2072 = vsyncmov [#allocation9] }
 0x309   :  { %s2073_s25 = vpop.sfrf %2072 }
 0x30a   :  { %p2924_p10 = scmp.ne.s32.totalorder %s2073_s25, 0 }
 0x30c   :  { %2077 = shalt.err (%p2924_p10)  }
 0x30d   :  { %2079 = vsyncmov [#allocation9 + $0x1] }
 0x310   :  { %s2080_s26 = vpop.sfrf %2079 }
 0x311   :  { %p2925_p11 = scmp.ne.s32.totalorder %s2080_s26, 0 }
 0x313   :  { %2084 = shalt.err (%p2925_p11)  }
 0x314   :  { %2085 = vsyncmov [#allocation10] }
 0x317   :  { %s2086_s27 = vpop.sfrf %2085 }
 0x318   :  { %p2926_p12 = scmp.ne.s32.totalorder %s2086_s27, 0 }
 0x31a   :  { %2090 = shalt.err (%p2926_p12)  }
 0x31b   :  { %2092 = vsyncmov [#allocation10 + $0x1] }
 0x31e   :  { %s2093_s28 = vpop.sfrf %2092 }
 0x31f   :  { %p2927_p13 = scmp.ne.s32.totalorder %s2093_s28, 0 }
 0x321   :  { %2097 = shalt.err (%p2927_p13)  }

</bundles_post_ra>
